<compile_context>
chip_gen: v7x
topology: tpu7x:2x2x1
jax: 0.10.0
libtpu: 0.0.40
codegen_flags: <defaults>
</compile_context>

<pallas_src>
import functools

import jax
import jax.numpy as jnp
from jax.experimental import pallas as pl
from jax.experimental.pallas import tpu as pltpu


# ----------------------------------------------------------------------------
# Fused forward kernel.  Token tensor layout: [C*V, H], c-major row blocks
# (rows c*V : (c+1)*V hold column position c for all V nodes).
# ----------------------------------------------------------------------------
def _bridge_kernel(
    emb_ref, hsel_ref, hselT_ref,
    wqkv_ref, bqkv_ref, wo_ref, bo_ref,
    ln1_g_ref, ln1_b_ref, w1_ref, b1_ref, w2_ref, b2_ref,
    ln2_g_ref, ln2_b_ref,
    fc_w_ref, fc_b_ref,
    x_rest_ref, adj_vv_ref, adj_vr_ref, gcn_w_ref, gcn_b_ref,
    o_ref,
    *, n_layers, n_cols, n_valid, heads, eps,
):
    f32 = jnp.float32
    x = emb_ref[...].astype(f32)                 # [C*V, H]
    H = x.shape[-1]
    V = n_valid
    C = n_cols
    dh = H // heads
    scale = 1.0 / (float(dh) ** 0.5)
    hsel = hsel_ref[...]                         # [H, heads]  block-diag head mask
    hselT = hselT_ref[...]                       # [heads, H]

    def matmul(a, w):
        return jnp.dot(a, w, preferred_element_type=f32)

    def layer_norm_residual(y, r, g, b):
        # fused residual add + layernorm over the lane (H) dim
        z = y + r
        mu = jnp.mean(z, axis=-1, keepdims=True)
        var = jnp.mean(jnp.square(z - mu), axis=-1, keepdims=True)
        return (z - mu) * jax.lax.rsqrt(var + eps) * g + b

    for l in range(n_layers):
        # ---- fused QKV projection: one [H, 3H] matmul, then lane slices ----
        qkv = matmul(x, wqkv_ref[l]) + bqkv_ref[l]           # [C*V, 3H]
        q = qkv[:, :H]
        k = qkv[:, H:2 * H]
        v = qkv[:, 2 * H:]

        # ---- multi-head self-attention over the C column positions --------
        # Batched (i, j) pair tensors, row order ((i*C + j)*V + n):
        #   q_rep[(i*C+j)*V + n] = q[i*V + n]
        #   k_rep[(i*C+j)*V + n] = k[j*V + n]
        q_rep = jnp.concatenate(
            [q[i * V:(i + 1) * V, :] for i in range(C) for _ in range(C)],
            axis=0)                                          # [C*C*V, H]
        k_rep = jnp.concatenate([k] * C, axis=0)             # [C*C*V, H]

        # per-head scores: elementwise q*k reduced inside each head's dh lanes
        # via ONE block-diagonal selection matmul (MXU) -> [C*C*V, heads]
        s_all = matmul(q_rep * k_rep, hsel) * scale

        # softmax over the j (key-column) axis, per (i, node, head)
        p_blocks = []
        for i in range(C):
            s_i = s_all[i * C * V:(i + 1) * C * V, :]        # [C*V, heads]
            sj = [s_i[j * V:(j + 1) * V, :] for j in range(C)]
            m = sj[0]
            for j in range(1, C):
                m = jnp.maximum(m, sj[j])
            ej = [jnp.exp(s - m) for s in sj]
            denom = ej[0]
            for j in range(1, C):
                denom = denom + ej[j]
            inv = pl.reciprocal(denom, approx=True)          # EUP slot, ~free
            p_blocks.extend([e * inv for e in ej])
        p_all = jnp.concatenate(p_blocks, axis=0)            # [C*C*V, heads]

        # broadcast per-head probs back to each head's dh lanes (one MXU
        # matmul) and weight the values, then reduce over j per query column.
        v_rep = jnp.concatenate([v] * C, axis=0)             # [C*C*V, H]
        w_all = matmul(p_all, hselT) * v_rep                 # [C*C*V, H]
        out_blocks = []
        for i in range(C):
            o_i = w_all[(i * C) * V:(i * C) * V + V, :]
            for j in range(1, C):
                o_i = o_i + w_all[(i * C + j) * V:(i * C + j + 1) * V, :]
            out_blocks.append(o_i)
        attn = jnp.concatenate(out_blocks, axis=0)           # [C*V, H]
        attn = matmul(attn, wo_ref[l]) + bo_ref[l]           # output projection

        # ---- residual + LN1 (fused) ----
        x = layer_norm_residual(x, attn, ln1_g_ref[l], ln1_b_ref[l])

        # ---- FFN: w1 -> relu -> w2 (VMEM resident) ----
        h1 = jnp.maximum(matmul(x, w1_ref[l]) + b1_ref[l], 0.0)
        ff = matmul(h1, w2_ref[l]) + b2_ref[l]

        # ---- residual + LN2 (fused) ----
        x = layer_norm_residual(x, ff, ln2_g_ref[l], ln2_b_ref[l])

    # ---- final FC over the flattened columns, done blockwise (no reshape) ----
    fc_w = fc_w_ref[...]                                     # [C*H, Dt]
    dt = fc_w.shape[-1]
    acc = jnp.zeros((V, dt), f32)
    for c in range(C):
        acc = acc + matmul(x[c * V:(c + 1) * V, :], fc_w[c * H:(c + 1) * H, :])
    x_valid = acc + fc_b_ref[...]                            # [V, Dt]

    # ---- GCN (graph_layers == 1): rows [:valid] of adj @ (x_total @ W) + b ----
    # TODO(synk): training-mode dropout not implemented (eval-mode identity).
    xw_valid = matmul(x_valid, gcn_w_ref[...])               # [V, Dg]
    xw_rest = matmul(x_rest_ref[...], gcn_w_ref[...])        # [total-V, Dg]
    out = (matmul(adj_vv_ref[...], xw_valid)
           + matmul(adj_vr_ref[...], xw_rest)
           + gcn_b_ref[...])                                 # [V, Dg]
    o_ref[...] = out.astype(o_ref.dtype)


# ----------------------------------------------------------------------------
# Wrapper: embedding gather (one jnp.take) + single fused pallas_call.
# ----------------------------------------------------------------------------
def bridge_forward(params, cat_feats, x_all, adj, valid, total, heads):
    C = cat_feats.shape[1]
    L, H, _ = params["wqkv"].shape
    dh = H // heads
    dg = params["gcn_w"].shape[1]

    # Single concatenated-table gather; rows ordered c-major: row = c*valid + v.
    idx = (cat_feats + params["emb_offsets"][None, :]).T.reshape(-1)    # [C*valid]
    emb_x = jnp.take(params["emb_table"], idx, axis=0)                  # [C*valid, H]

    # Block-diagonal head-selection mask: hsel[d, h] = 1 iff d // dh == h.
    hsel = (jnp.arange(H)[:, None] // dh
            == jnp.arange(heads)[None, :]).astype(jnp.float32)          # [H, heads]
    hselT = hsel.T                                                      # [heads, H]

    x_rest = x_all[valid:total, :]                                      # [total-V, Dt]
    adj_vv = adj[:valid, :valid]                                        # [V, V]
    adj_vr = adj[:valid, valid:total]                                   # [V, total-V]

    inputs = (
        emb_x, hsel, hselT,
        params["wqkv"], params["bqkv"], params["wo"], params["bo"],
        params["ln1_g"], params["ln1_b"],
        params["w1"], params["b1"], params["w2"], params["b2"],
        params["ln2_g"], params["ln2_b"],
        params["fc_w"], params["fc_b"],
        x_rest, adj_vv, adj_vr,
        params["gcn_w"], params["gcn_b"],
    )

    kernel = functools.partial(
        _bridge_kernel,
        n_layers=L, n_cols=C, n_valid=valid, heads=heads, eps=1e-5)

    vmem_spec = pl.BlockSpec(memory_space=pltpu.MemorySpace.VMEM)
    return pl.pallas_call(
        kernel,
        in_specs=[vmem_spec] * len(inputs),
        out_specs=vmem_spec,
        out_shape=jax.ShapeDtypeStruct((valid, dg), jnp.float32),
    )(*inputs)


# ----------------------------------------------------------------------------
# Deterministic parameter construction and smoke test.
# ----------------------------------------------------------------------------
def _init(key, shape, scale=0.1):
    return scale * jax.random.normal(key, shape, dtype=jnp.float32)


def build_params(key, cards, hidden, out_dim, n_layers, graph_out_dim):
    C = len(cards)
    ffn = 2 * hidden
    keys = iter(jax.random.split(key, C + 4 * n_layers + 2))

    emb_tables = [_init(next(keys), (cards[c], hidden)) for c in range(C)]
    offs, acc = [], 0
    for card in cards:
        offs.append(acc)
        acc += card

    def stack(shape):
        return jnp.stack([_init(next(keys), shape) for _ in range(n_layers)], axis=0)

    wqkv = stack((hidden, 3 * hidden))
    wo = stack((hidden, hidden))
    w1 = stack((hidden, ffn))
    w2 = stack((ffn, hidden))

    params = {
        "emb_table": jnp.concatenate(emb_tables, axis=0),        # [sum(cards), H]
        "emb_offsets": jnp.asarray(offs, dtype=jnp.int32),       # [C]
        "wqkv": wqkv,
        "bqkv": jnp.zeros((n_layers, 1, 3 * hidden), jnp.float32),
        "wo": wo,
        "bo": jnp.zeros((n_layers, 1, hidden), jnp.float32),
        "ln1_g": jnp.ones((n_layers, 1, hidden), jnp.float32),
        "ln1_b": jnp.zeros((n_layers, 1, hidden), jnp.float32),
        "w1": w1,
        "b1": jnp.zeros((n_layers, 1, ffn), jnp.float32),
        "w2": w2,
        "b2": jnp.zeros((n_layers, 1, hidden), jnp.float32),
        "ln2_g": jnp.ones((n_layers, 1, hidden), jnp.float32),
        "ln2_b": jnp.zeros((n_layers, 1, hidden), jnp.float32),
        "fc_w": _init(next(keys), (C * hidden, out_dim)),
        "fc_b": jnp.zeros((1, out_dim), jnp.float32),
        "gcn_w": _init(next(keys), (out_dim, graph_out_dim)),
        "gcn_b": jnp.zeros((1, graph_out_dim), jnp.float32),
    }
    return params


if __name__ == "__main__":
    # Small configuration consistent with the module defaults.
    valid, total = 8, 12
    cards = [5, 7, 6, 8]            # cardinalities of the categorical columns
    table_hidden_dim = 32
    table_output_dim = 32
    table_layers = 2
    table_heads = 8
    graph_output_dim = 16

    key = jax.random.PRNGKey(0)
    k_par, k_feat, k_x, k_adj = jax.random.split(key, 4)

    params = build_params(
        k_par, cards, table_hidden_dim, table_output_dim, table_layers, graph_output_dim
    )

    # Categorical table features for the `valid` table-backed nodes.
    feat_keys = jax.random.split(k_feat, len(cards))
    cat_feats = jnp.stack(
        [jax.random.randint(feat_keys[c], (valid,), 0, cards[c]) for c in range(len(cards))],
        axis=1,
    ).astype(jnp.int32)                                       # [valid, C]

    # Pre-existing node feature matrix (rows valid..total are used by forward).
    x_all = jax.random.normal(k_x, (total, table_output_dim), dtype=jnp.float32)

    # Symmetric normalized adjacency D^{-1/2} (A + I) D^{-1/2}.
    a = (jax.random.uniform(k_adj, (total, total)) > 0.6).astype(jnp.float32)
    a = jnp.maximum(a, a.T) + jnp.eye(total, dtype=jnp.float32)
    deg = jnp.sum(a, axis=1)
    dinv = 1.0 / jnp.sqrt(deg)
    adj = a * dinv[:, None] * dinv[None, :]                   # [total, total]

    fwd = jax.jit(bridge_forward, static_argnums=(4, 5, 6))
    out = fwd(params, cat_feats, x_all, adj, valid, total, table_heads)
    out = jax.block_until_ready(out)
    assert out.shape == (valid, graph_output_dim), out.shape
    assert jnp.all(jnp.isfinite(out))
    print("KERNEL_OK")
</pallas_src>

<mosaic_0001>
module attributes {stable_mosaic.version = 11 : i64} {
  func.func @_bridge_kernel(%arg0: memref<32x32xf32, #tpu.memory_space<vmem>>, %arg1: memref<32x8xf32, #tpu.memory_space<vmem>>, %arg2: memref<8x32xf32, #tpu.memory_space<vmem>>, %arg3: memref<2x32x96xf32, #tpu.memory_space<vmem>>, %arg4: memref<2x1x96xf32, #tpu.memory_space<vmem>>, %arg5: memref<2x32x32xf32, #tpu.memory_space<vmem>>, %arg6: memref<2x1x32xf32, #tpu.memory_space<vmem>>, %arg7: memref<2x1x32xf32, #tpu.memory_space<vmem>>, %arg8: memref<2x1x32xf32, #tpu.memory_space<vmem>>, %arg9: memref<2x32x64xf32, #tpu.memory_space<vmem>>, %arg10: memref<2x1x64xf32, #tpu.memory_space<vmem>>, %arg11: memref<2x64x32xf32, #tpu.memory_space<vmem>>, %arg12: memref<2x1x32xf32, #tpu.memory_space<vmem>>, %arg13: memref<2x1x32xf32, #tpu.memory_space<vmem>>, %arg14: memref<2x1x32xf32, #tpu.memory_space<vmem>>, %arg15: memref<128x32xf32, #tpu.memory_space<vmem>>, %arg16: memref<1x32xf32, #tpu.memory_space<vmem>>, %arg17: memref<4x32xf32, #tpu.memory_space<vmem>>, %arg18: memref<8x8xf32, #tpu.memory_space<vmem>>, %arg19: memref<8x4xf32, #tpu.memory_space<vmem>>, %arg20: memref<32x16xf32, #tpu.memory_space<vmem>>, %arg21: memref<1x16xf32, #tpu.memory_space<vmem>>, %arg22: memref<8x16xf32, #tpu.memory_space<vmem>>) attributes {dimension_semantics = [], scalar_prefetch = 0 : i64, scratch_operands = 0 : i64, tpu.core_type = #tpu.core_type<tc>} {
    %c0 = arith.constant 0 : index
    %c0_0 = arith.constant 0 : index
    %0 = vector.load %arg0[%c0, %c0_0] : memref<32x32xf32, #tpu.memory_space<vmem>>, vector<32x32xf32>
    %c0_1 = arith.constant 0 : index
    %c0_2 = arith.constant 0 : index
    %1 = vector.load %arg1[%c0_1, %c0_2] : memref<32x8xf32, #tpu.memory_space<vmem>>, vector<32x8xf32>
    %c0_3 = arith.constant 0 : index
    %c0_4 = arith.constant 0 : index
    %2 = vector.load %arg2[%c0_3, %c0_4] : memref<8x32xf32, #tpu.memory_space<vmem>>, vector<8x32xf32>
    %c0_5 = arith.constant 0 : index
    %c0_6 = arith.constant 0 : index
    %c0_7 = arith.constant 0 : index
    %3 = vector.load %arg3[%c0_5, %c0_6, %c0_7] : memref<2x32x96xf32, #tpu.memory_space<vmem>>, vector<1x32x96xf32>
    %4 = vector.shape_cast %3 : vector<1x32x96xf32> to vector<32x96xf32>
    %cst = arith.constant dense<0.000000e+00> : vector<32x96xf32>
    %5 = tpu.matmul %0, %4, %cst {dimension_numbers = #tpu.dot_dimension_numbers<[1], [0], [0], [1], [0, 0, 1, 1], [], []>} : vector<32x32xf32>, vector<32x96xf32>, vector<32x96xf32> -> vector<32x96xf32>
    %c0_8 = arith.constant 0 : index
    %c0_9 = arith.constant 0 : index
    %c0_10 = arith.constant 0 : index
    %6 = vector.load %arg4[%c0_8, %c0_9, %c0_10] : memref<2x1x96xf32, #tpu.memory_space<vmem>>, vector<1x1x96xf32>
    %7 = vector.shape_cast %6 : vector<1x1x96xf32> to vector<1x96xf32>
    %8 = vector.broadcast %7 : vector<1x96xf32> to vector<32x96xf32>
    %9 = arith.addf %5, %8 : vector<32x96xf32>
    %10 = vector.extract_strided_slice %9 {offsets = [0, 0], sizes = [32, 32], strides = [1, 1]} : vector<32x96xf32> to vector<32x32xf32>
    %11 = vector.extract_strided_slice %9 {offsets = [0, 32], sizes = [32, 32], strides = [1, 1]} : vector<32x96xf32> to vector<32x32xf32>
    %12 = vector.extract_strided_slice %9 {offsets = [0, 64], sizes = [32, 32], strides = [1, 1]} : vector<32x96xf32> to vector<32x32xf32>
    %13 = vector.extract_strided_slice %10 {offsets = [0, 0], sizes = [8, 32], strides = [1, 1]} : vector<32x32xf32> to vector<8x32xf32>
    %14 = vector.extract_strided_slice %10 {offsets = [0, 0], sizes = [8, 32], strides = [1, 1]} : vector<32x32xf32> to vector<8x32xf32>
    %15 = vector.extract_strided_slice %10 {offsets = [0, 0], sizes = [8, 32], strides = [1, 1]} : vector<32x32xf32> to vector<8x32xf32>
    %16 = vector.extract_strided_slice %10 {offsets = [0, 0], sizes = [8, 32], strides = [1, 1]} : vector<32x32xf32> to vector<8x32xf32>
    %17 = vector.extract_strided_slice %10 {offsets = [8, 0], sizes = [8, 32], strides = [1, 1]} : vector<32x32xf32> to vector<8x32xf32>
    %18 = vector.extract_strided_slice %10 {offsets = [8, 0], sizes = [8, 32], strides = [1, 1]} : vector<32x32xf32> to vector<8x32xf32>
    %19 = vector.extract_strided_slice %10 {offsets = [8, 0], sizes = [8, 32], strides = [1, 1]} : vector<32x32xf32> to vector<8x32xf32>
    %20 = vector.extract_strided_slice %10 {offsets = [8, 0], sizes = [8, 32], strides = [1, 1]} : vector<32x32xf32> to vector<8x32xf32>
    %21 = vector.extract_strided_slice %10 {offsets = [16, 0], sizes = [8, 32], strides = [1, 1]} : vector<32x32xf32> to vector<8x32xf32>
    %22 = vector.extract_strided_slice %10 {offsets = [16, 0], sizes = [8, 32], strides = [1, 1]} : vector<32x32xf32> to vector<8x32xf32>
    %23 = vector.extract_strided_slice %10 {offsets = [16, 0], sizes = [8, 32], strides = [1, 1]} : vector<32x32xf32> to vector<8x32xf32>
    %24 = vector.extract_strided_slice %10 {offsets = [16, 0], sizes = [8, 32], strides = [1, 1]} : vector<32x32xf32> to vector<8x32xf32>
    %25 = vector.extract_strided_slice %10 {offsets = [24, 0], sizes = [8, 32], strides = [1, 1]} : vector<32x32xf32> to vector<8x32xf32>
    %26 = vector.extract_strided_slice %10 {offsets = [24, 0], sizes = [8, 32], strides = [1, 1]} : vector<32x32xf32> to vector<8x32xf32>
    %27 = vector.extract_strided_slice %10 {offsets = [24, 0], sizes = [8, 32], strides = [1, 1]} : vector<32x32xf32> to vector<8x32xf32>
    %28 = vector.extract_strided_slice %10 {offsets = [24, 0], sizes = [8, 32], strides = [1, 1]} : vector<32x32xf32> to vector<8x32xf32>
    %29 = tpu.concatenate %13, %14, %15, %16, %17, %18, %19, %20, %21, %22, %23, %24, %25, %26, %27, %28 in 0 : vector<8x32xf32>, vector<8x32xf32>, vector<8x32xf32>, vector<8x32xf32>, vector<8x32xf32>, vector<8x32xf32>, vector<8x32xf32>, vector<8x32xf32>, vector<8x32xf32>, vector<8x32xf32>, vector<8x32xf32>, vector<8x32xf32>, vector<8x32xf32>, vector<8x32xf32>, vector<8x32xf32>, vector<8x32xf32> -> vector<128x32xf32>
    %30 = tpu.concatenate %11, %11, %11, %11 in 0 : vector<32x32xf32>, vector<32x32xf32>, vector<32x32xf32>, vector<32x32xf32> -> vector<128x32xf32>
    %31 = arith.mulf %29, %30 : vector<128x32xf32>
    %cst_11 = arith.constant dense<0.000000e+00> : vector<128x8xf32>
    %32 = tpu.matmul %31, %1, %cst_11 {dimension_numbers = #tpu.dot_dimension_numbers<[1], [0], [0], [1], [0, 0, 1, 1], [], []>} : vector<128x32xf32>, vector<32x8xf32>, vector<128x8xf32> -> vector<128x8xf32>
    %cst_12 = arith.constant 5.000000e-01 : f32
    %33 = vector.broadcast %cst_12 : f32 to vector<128x8xf32>
    %34 = arith.mulf %32, %33 : vector<128x8xf32>
    %35 = vector.extract_strided_slice %34 {offsets = [0, 0], sizes = [32, 8], strides = [1, 1]} : vector<128x8xf32> to vector<32x8xf32>
    %36 = vector.extract_strided_slice %35 {offsets = [0, 0], sizes = [8, 8], strides = [1, 1]} : vector<32x8xf32> to vector<8x8xf32>
    %37 = vector.extract_strided_slice %35 {offsets = [8, 0], sizes = [8, 8], strides = [1, 1]} : vector<32x8xf32> to vector<8x8xf32>
    %38 = vector.extract_strided_slice %35 {offsets = [16, 0], sizes = [8, 8], strides = [1, 1]} : vector<32x8xf32> to vector<8x8xf32>
    %39 = vector.extract_strided_slice %35 {offsets = [24, 0], sizes = [8, 8], strides = [1, 1]} : vector<32x8xf32> to vector<8x8xf32>
    %40 = arith.maximumf %36, %37 : vector<8x8xf32>
    %41 = arith.maximumf %40, %38 : vector<8x8xf32>
    %42 = arith.maximumf %41, %39 : vector<8x8xf32>
    %43 = arith.subf %36, %42 : vector<8x8xf32>
    %44 = math.exp %43 : vector<8x8xf32>
    %45 = arith.subf %37, %42 : vector<8x8xf32>
    %46 = math.exp %45 : vector<8x8xf32>
    %47 = arith.subf %38, %42 : vector<8x8xf32>
    %48 = math.exp %47 : vector<8x8xf32>
    %49 = arith.subf %39, %42 : vector<8x8xf32>
    %50 = math.exp %49 : vector<8x8xf32>
    %51 = arith.addf %44, %46 : vector<8x8xf32>
    %52 = arith.addf %51, %48 : vector<8x8xf32>
    %53 = arith.addf %52, %50 : vector<8x8xf32>
    %54 = tpu.reciprocal %53 {approx = true} : vector<8x8xf32> -> vector<8x8xf32>
    %55 = arith.mulf %44, %54 : vector<8x8xf32>
    %56 = arith.mulf %46, %54 : vector<8x8xf32>
    %57 = arith.mulf %48, %54 : vector<8x8xf32>
    %58 = arith.mulf %50, %54 : vector<8x8xf32>
    %59 = vector.extract_strided_slice %34 {offsets = [32, 0], sizes = [32, 8], strides = [1, 1]} : vector<128x8xf32> to vector<32x8xf32>
    %60 = vector.extract_strided_slice %59 {offsets = [0, 0], sizes = [8, 8], strides = [1, 1]} : vector<32x8xf32> to vector<8x8xf32>
    %61 = vector.extract_strided_slice %59 {offsets = [8, 0], sizes = [8, 8], strides = [1, 1]} : vector<32x8xf32> to vector<8x8xf32>
    %62 = vector.extract_strided_slice %59 {offsets = [16, 0], sizes = [8, 8], strides = [1, 1]} : vector<32x8xf32> to vector<8x8xf32>
    %63 = vector.extract_strided_slice %59 {offsets = [24, 0], sizes = [8, 8], strides = [1, 1]} : vector<32x8xf32> to vector<8x8xf32>
    %64 = arith.maximumf %60, %61 : vector<8x8xf32>
    %65 = arith.maximumf %64, %62 : vector<8x8xf32>
    %66 = arith.maximumf %65, %63 : vector<8x8xf32>
    %67 = arith.subf %60, %66 : vector<8x8xf32>
    %68 = math.exp %67 : vector<8x8xf32>
    %69 = arith.subf %61, %66 : vector<8x8xf32>
    %70 = math.exp %69 : vector<8x8xf32>
    %71 = arith.subf %62, %66 : vector<8x8xf32>
    %72 = math.exp %71 : vector<8x8xf32>
    %73 = arith.subf %63, %66 : vector<8x8xf32>
    %74 = math.exp %73 : vector<8x8xf32>
    %75 = arith.addf %68, %70 : vector<8x8xf32>
    %76 = arith.addf %75, %72 : vector<8x8xf32>
    %77 = arith.addf %76, %74 : vector<8x8xf32>
    %78 = tpu.reciprocal %77 {approx = true} : vector<8x8xf32> -> vector<8x8xf32>
    %79 = arith.mulf %68, %78 : vector<8x8xf32>
    %80 = arith.mulf %70, %78 : vector<8x8xf32>
    %81 = arith.mulf %72, %78 : vector<8x8xf32>
    %82 = arith.mulf %74, %78 : vector<8x8xf32>
    %83 = vector.extract_strided_slice %34 {offsets = [64, 0], sizes = [32, 8], strides = [1, 1]} : vector<128x8xf32> to vector<32x8xf32>
    %84 = vector.extract_strided_slice %83 {offsets = [0, 0], sizes = [8, 8], strides = [1, 1]} : vector<32x8xf32> to vector<8x8xf32>
    %85 = vector.extract_strided_slice %83 {offsets = [8, 0], sizes = [8, 8], strides = [1, 1]} : vector<32x8xf32> to vector<8x8xf32>
    %86 = vector.extract_strided_slice %83 {offsets = [16, 0], sizes = [8, 8], strides = [1, 1]} : vector<32x8xf32> to vector<8x8xf32>
    %87 = vector.extract_strided_slice %83 {offsets = [24, 0], sizes = [8, 8], strides = [1, 1]} : vector<32x8xf32> to vector<8x8xf32>
    %88 = arith.maximumf %84, %85 : vector<8x8xf32>
    %89 = arith.maximumf %88, %86 : vector<8x8xf32>
    %90 = arith.maximumf %89, %87 : vector<8x8xf32>
    %91 = arith.subf %84, %90 : vector<8x8xf32>
    %92 = math.exp %91 : vector<8x8xf32>
    %93 = arith.subf %85, %90 : vector<8x8xf32>
    %94 = math.exp %93 : vector<8x8xf32>
    %95 = arith.subf %86, %90 : vector<8x8xf32>
    %96 = math.exp %95 : vector<8x8xf32>
    %97 = arith.subf %87, %90 : vector<8x8xf32>
    %98 = math.exp %97 : vector<8x8xf32>
    %99 = arith.addf %92, %94 : vector<8x8xf32>
    %100 = arith.addf %99, %96 : vector<8x8xf32>
    %101 = arith.addf %100, %98 : vector<8x8xf32>
    %102 = tpu.reciprocal %101 {approx = true} : vector<8x8xf32> -> vector<8x8xf32>
    %103 = arith.mulf %92, %102 : vector<8x8xf32>
    %104 = arith.mulf %94, %102 : vector<8x8xf32>
    %105 = arith.mulf %96, %102 : vector<8x8xf32>
    %106 = arith.mulf %98, %102 : vector<8x8xf32>
    %107 = vector.extract_strided_slice %34 {offsets = [96, 0], sizes = [32, 8], strides = [1, 1]} : vector<128x8xf32> to vector<32x8xf32>
    %108 = vector.extract_strided_slice %107 {offsets = [0, 0], sizes = [8, 8], strides = [1, 1]} : vector<32x8xf32> to vector<8x8xf32>
    %109 = vector.extract_strided_slice %107 {offsets = [8, 0], sizes = [8, 8], strides = [1, 1]} : vector<32x8xf32> to vector<8x8xf32>
    %110 = vector.extract_strided_slice %107 {offsets = [16, 0], sizes = [8, 8], strides = [1, 1]} : vector<32x8xf32> to vector<8x8xf32>
    %111 = vector.extract_strided_slice %107 {offsets = [24, 0], sizes = [8, 8], strides = [1, 1]} : vector<32x8xf32> to vector<8x8xf32>
    %112 = arith.maximumf %108, %109 : vector<8x8xf32>
    %113 = arith.maximumf %112, %110 : vector<8x8xf32>
    %114 = arith.maximumf %113, %111 : vector<8x8xf32>
    %115 = arith.subf %108, %114 : vector<8x8xf32>
    %116 = math.exp %115 : vector<8x8xf32>
    %117 = arith.subf %109, %114 : vector<8x8xf32>
    %118 = math.exp %117 : vector<8x8xf32>
    %119 = arith.subf %110, %114 : vector<8x8xf32>
    %120 = math.exp %119 : vector<8x8xf32>
    %121 = arith.subf %111, %114 : vector<8x8xf32>
    %122 = math.exp %121 : vector<8x8xf32>
    %123 = arith.addf %116, %118 : vector<8x8xf32>
    %124 = arith.addf %123, %120 : vector<8x8xf32>
    %125 = arith.addf %124, %122 : vector<8x8xf32>
    %126 = tpu.reciprocal %125 {approx = true} : vector<8x8xf32> -> vector<8x8xf32>
    %127 = arith.mulf %116, %126 : vector<8x8xf32>
    %128 = arith.mulf %118, %126 : vector<8x8xf32>
    %129 = arith.mulf %120, %126 : vector<8x8xf32>
    %130 = arith.mulf %122, %126 : vector<8x8xf32>
    %131 = tpu.concatenate %55, %56, %57, %58, %79, %80, %81, %82, %103, %104, %105, %106, %127, %128, %129, %130 in 0 : vector<8x8xf32>, vector<8x8xf32>, vector<8x8xf32>, vector<8x8xf32>, vector<8x8xf32>, vector<8x8xf32>, vector<8x8xf32>, vector<8x8xf32>, vector<8x8xf32>, vector<8x8xf32>, vector<8x8xf32>, vector<8x8xf32>, vector<8x8xf32>, vector<8x8xf32>, vector<8x8xf32>, vector<8x8xf32> -> vector<128x8xf32>
    %132 = tpu.concatenate %12, %12, %12, %12 in 0 : vector<32x32xf32>, vector<32x32xf32>, vector<32x32xf32>, vector<32x32xf32> -> vector<128x32xf32>
    %cst_13 = arith.constant dense<0.000000e+00> : vector<128x32xf32>
    %133 = tpu.matmul %131, %2, %cst_13 {dimension_numbers = #tpu.dot_dimension_numbers<[1], [0], [0], [1], [0, 0, 1, 1], [], []>} : vector<128x8xf32>, vector<8x32xf32>, vector<128x32xf32> -> vector<128x32xf32>
    %134 = arith.mulf %133, %132 : vector<128x32xf32>
    %135 = vector.extract_strided_slice %134 {offsets = [0, 0], sizes = [8, 32], strides = [1, 1]} : vector<128x32xf32> to vector<8x32xf32>
    %136 = vector.extract_strided_slice %134 {offsets = [8, 0], sizes = [8, 32], strides = [1, 1]} : vector<128x32xf32> to vector<8x32xf32>
    %137 = arith.addf %135, %136 : vector<8x32xf32>
    %138 = vector.extract_strided_slice %134 {offsets = [16, 0], sizes = [8, 32], strides = [1, 1]} : vector<128x32xf32> to vector<8x32xf32>
    %139 = arith.addf %137, %138 : vector<8x32xf32>
    %140 = vector.extract_strided_slice %134 {offsets = [24, 0], sizes = [8, 32], strides = [1, 1]} : vector<128x32xf32> to vector<8x32xf32>
    %141 = arith.addf %139, %140 : vector<8x32xf32>
    %142 = vector.extract_strided_slice %134 {offsets = [32, 0], sizes = [8, 32], strides = [1, 1]} : vector<128x32xf32> to vector<8x32xf32>
    %143 = vector.extract_strided_slice %134 {offsets = [40, 0], sizes = [8, 32], strides = [1, 1]} : vector<128x32xf32> to vector<8x32xf32>
    %144 = arith.addf %142, %143 : vector<8x32xf32>
    %145 = vector.extract_strided_slice %134 {offsets = [48, 0], sizes = [8, 32], strides = [1, 1]} : vector<128x32xf32> to vector<8x32xf32>
    %146 = arith.addf %144, %145 : vector<8x32xf32>
    %147 = vector.extract_strided_slice %134 {offsets = [56, 0], sizes = [8, 32], strides = [1, 1]} : vector<128x32xf32> to vector<8x32xf32>
    %148 = arith.addf %146, %147 : vector<8x32xf32>
    %149 = vector.extract_strided_slice %134 {offsets = [64, 0], sizes = [8, 32], strides = [1, 1]} : vector<128x32xf32> to vector<8x32xf32>
    %150 = vector.extract_strided_slice %134 {offsets = [72, 0], sizes = [8, 32], strides = [1, 1]} : vector<128x32xf32> to vector<8x32xf32>
    %151 = arith.addf %149, %150 : vector<8x32xf32>
    %152 = vector.extract_strided_slice %134 {offsets = [80, 0], sizes = [8, 32], strides = [1, 1]} : vector<128x32xf32> to vector<8x32xf32>
    %153 = arith.addf %151, %152 : vector<8x32xf32>
    %154 = vector.extract_strided_slice %134 {offsets = [88, 0], sizes = [8, 32], strides = [1, 1]} : vector<128x32xf32> to vector<8x32xf32>
    %155 = arith.addf %153, %154 : vector<8x32xf32>
    %156 = vector.extract_strided_slice %134 {offsets = [96, 0], sizes = [8, 32], strides = [1, 1]} : vector<128x32xf32> to vector<8x32xf32>
    %157 = vector.extract_strided_slice %134 {offsets = [104, 0], sizes = [8, 32], strides = [1, 1]} : vector<128x32xf32> to vector<8x32xf32>
    %158 = arith.addf %156, %157 : vector<8x32xf32>
    %159 = vector.extract_strided_slice %134 {offsets = [112, 0], sizes = [8, 32], strides = [1, 1]} : vector<128x32xf32> to vector<8x32xf32>
    %160 = arith.addf %158, %159 : vector<8x32xf32>
    %161 = vector.extract_strided_slice %134 {offsets = [120, 0], sizes = [8, 32], strides = [1, 1]} : vector<128x32xf32> to vector<8x32xf32>
    %162 = arith.addf %160, %161 : vector<8x32xf32>
    %163 = tpu.concatenate %141, %148, %155, %162 in 0 : vector<8x32xf32>, vector<8x32xf32>, vector<8x32xf32>, vector<8x32xf32> -> vector<32x32xf32>
    %c0_14 = arith.constant 0 : index
    %c0_15 = arith.constant 0 : index
    %c0_16 = arith.constant 0 : index
    %164 = vector.load %arg5[%c0_14, %c0_15, %c0_16] : memref<2x32x32xf32, #tpu.memory_space<vmem>>, vector<1x32x32xf32>
    %165 = vector.shape_cast %164 : vector<1x32x32xf32> to vector<32x32xf32>
    %cst_17 = arith.constant dense<0.000000e+00> : vector<32x32xf32>
    %166 = tpu.matmul %163, %165, %cst_17 {dimension_numbers = #tpu.dot_dimension_numbers<[1], [0], [0], [1], [0, 0, 1, 1], [], []>} : vector<32x32xf32>, vector<32x32xf32>, vector<32x32xf32> -> vector<32x32xf32>
    %c0_18 = arith.constant 0 : index
    %c0_19 = arith.constant 0 : index
    %c0_20 = arith.constant 0 : index
    %167 = vector.load %arg6[%c0_18, %c0_19, %c0_20] : memref<2x1x32xf32, #tpu.memory_space<vmem>>, vector<1x1x32xf32>
    %168 = vector.shape_cast %167 : vector<1x1x32xf32> to vector<1x32xf32>
    %169 = vector.broadcast %168 : vector<1x32xf32> to vector<32x32xf32>
    %170 = arith.addf %166, %169 : vector<32x32xf32>
    %c0_21 = arith.constant 0 : index
    %c0_22 = arith.constant 0 : index
    %c0_23 = arith.constant 0 : index
    %171 = vector.load %arg7[%c0_21, %c0_22, %c0_23] : memref<2x1x32xf32, #tpu.memory_space<vmem>>, vector<1x1x32xf32>
    %172 = vector.shape_cast %171 : vector<1x1x32xf32> to vector<1x32xf32>
    %c0_24 = arith.constant 0 : index
    %c0_25 = arith.constant 0 : index
    %c0_26 = arith.constant 0 : index
    %173 = vector.load %arg8[%c0_24, %c0_25, %c0_26] : memref<2x1x32xf32, #tpu.memory_space<vmem>>, vector<1x1x32xf32>
    %174 = vector.shape_cast %173 : vector<1x1x32xf32> to vector<1x32xf32>
    %175 = arith.addf %0, %170 : vector<32x32xf32>
    %cst_27 = arith.constant dense<0.000000e+00> : vector<32xf32>
    %176 = vector.multi_reduction <add>, %175, %cst_27 [1] : vector<32x32xf32> to vector<32xf32>
    %177 = vector.shape_cast %176 : vector<32xf32> to vector<32x1xf32>
    %cst_28 = arith.constant 3.200000e+01 : f32
    %178 = vector.broadcast %cst_28 : f32 to vector<32x1xf32>
    %179 = arith.divf %177, %178 : vector<32x1xf32>
    %180 = vector.broadcast %179 : vector<32x1xf32> to vector<32x32xf32>
    %181 = arith.subf %175, %180 : vector<32x32xf32>
    %182 = arith.mulf %181, %181 : vector<32x32xf32>
    %cst_29 = arith.constant dense<0.000000e+00> : vector<32xf32>
    %183 = vector.multi_reduction <add>, %182, %cst_29 [1] : vector<32x32xf32> to vector<32xf32>
    %184 = vector.shape_cast %183 : vector<32xf32> to vector<32x1xf32>
    %cst_30 = arith.constant 3.200000e+01 : f32
    %185 = vector.broadcast %cst_30 : f32 to vector<32x1xf32>
    %186 = arith.divf %184, %185 : vector<32x1xf32>
    %187 = vector.broadcast %179 : vector<32x1xf32> to vector<32x32xf32>
    %188 = arith.subf %175, %187 : vector<32x32xf32>
    %cst_31 = arith.constant 9.99999974E-6 : f32
    %189 = vector.broadcast %cst_31 : f32 to vector<32x1xf32>
    %190 = arith.addf %186, %189 : vector<32x1xf32>
    %191 = math.rsqrt %190 : vector<32x1xf32>
    %192 = vector.broadcast %191 : vector<32x1xf32> to vector<32x32xf32>
    %193 = arith.mulf %188, %192 : vector<32x32xf32>
    %194 = vector.broadcast %172 : vector<1x32xf32> to vector<32x32xf32>
    %195 = arith.mulf %193, %194 : vector<32x32xf32>
    %196 = vector.broadcast %174 : vector<1x32xf32> to vector<32x32xf32>
    %197 = arith.addf %195, %196 : vector<32x32xf32>
    %c0_32 = arith.constant 0 : index
    %c0_33 = arith.constant 0 : index
    %c0_34 = arith.constant 0 : index
    %198 = vector.load %arg9[%c0_32, %c0_33, %c0_34] : memref<2x32x64xf32, #tpu.memory_space<vmem>>, vector<1x32x64xf32>
    %199 = vector.shape_cast %198 : vector<1x32x64xf32> to vector<32x64xf32>
    %cst_35 = arith.constant dense<0.000000e+00> : vector<32x64xf32>
    %200 = tpu.matmul %197, %199, %cst_35 {dimension_numbers = #tpu.dot_dimension_numbers<[1], [0], [0], [1], [0, 0, 1, 1], [], []>} : vector<32x32xf32>, vector<32x64xf32>, vector<32x64xf32> -> vector<32x64xf32>
    %c0_36 = arith.constant 0 : index
    %c0_37 = arith.constant 0 : index
    %c0_38 = arith.constant 0 : index
    %201 = vector.load %arg10[%c0_36, %c0_37, %c0_38] : memref<2x1x64xf32, #tpu.memory_space<vmem>>, vector<1x1x64xf32>
    %202 = vector.shape_cast %201 : vector<1x1x64xf32> to vector<1x64xf32>
    %203 = vector.broadcast %202 : vector<1x64xf32> to vector<32x64xf32>
    %204 = arith.addf %200, %203 : vector<32x64xf32>
    %cst_39 = arith.constant 0.000000e+00 : f32
    %205 = vector.broadcast %cst_39 : f32 to vector<32x64xf32>
    %206 = arith.maximumf %204, %205 : vector<32x64xf32>
    %c0_40 = arith.constant 0 : index
    %c0_41 = arith.constant 0 : index
    %c0_42 = arith.constant 0 : index
    %207 = vector.load %arg11[%c0_40, %c0_41, %c0_42] : memref<2x64x32xf32, #tpu.memory_space<vmem>>, vector<1x64x32xf32>
    %208 = vector.shape_cast %207 : vector<1x64x32xf32> to vector<64x32xf32>
    %cst_43 = arith.constant dense<0.000000e+00> : vector<32x32xf32>
    %209 = tpu.matmul %206, %208, %cst_43 {dimension_numbers = #tpu.dot_dimension_numbers<[1], [0], [0], [1], [0, 0, 1, 1], [], []>} : vector<32x64xf32>, vector<64x32xf32>, vector<32x32xf32> -> vector<32x32xf32>
    %c0_44 = arith.constant 0 : index
    %c0_45 = arith.constant 0 : index
    %c0_46 = arith.constant 0 : index
    %210 = vector.load %arg12[%c0_44, %c0_45, %c0_46] : memref<2x1x32xf32, #tpu.memory_space<vmem>>, vector<1x1x32xf32>
    %211 = vector.shape_cast %210 : vector<1x1x32xf32> to vector<1x32xf32>
    %212 = vector.broadcast %211 : vector<1x32xf32> to vector<32x32xf32>
    %213 = arith.addf %209, %212 : vector<32x32xf32>
    %c0_47 = arith.constant 0 : index
    %c0_48 = arith.constant 0 : index
    %c0_49 = arith.constant 0 : index
    %214 = vector.load %arg13[%c0_47, %c0_48, %c0_49] : memref<2x1x32xf32, #tpu.memory_space<vmem>>, vector<1x1x32xf32>
    %215 = vector.shape_cast %214 : vector<1x1x32xf32> to vector<1x32xf32>
    %c0_50 = arith.constant 0 : index
    %c0_51 = arith.constant 0 : index
    %c0_52 = arith.constant 0 : index
    %216 = vector.load %arg14[%c0_50, %c0_51, %c0_52] : memref<2x1x32xf32, #tpu.memory_space<vmem>>, vector<1x1x32xf32>
    %217 = vector.shape_cast %216 : vector<1x1x32xf32> to vector<1x32xf32>
    %218 = arith.addf %197, %213 : vector<32x32xf32>
    %cst_53 = arith.constant dense<0.000000e+00> : vector<32xf32>
    %219 = vector.multi_reduction <add>, %218, %cst_53 [1] : vector<32x32xf32> to vector<32xf32>
    %220 = vector.shape_cast %219 : vector<32xf32> to vector<32x1xf32>
    %cst_54 = arith.constant 3.200000e+01 : f32
    %221 = vector.broadcast %cst_54 : f32 to vector<32x1xf32>
    %222 = arith.divf %220, %221 : vector<32x1xf32>
    %223 = vector.broadcast %222 : vector<32x1xf32> to vector<32x32xf32>
    %224 = arith.subf %218, %223 : vector<32x32xf32>
    %225 = arith.mulf %224, %224 : vector<32x32xf32>
    %cst_55 = arith.constant dense<0.000000e+00> : vector<32xf32>
    %226 = vector.multi_reduction <add>, %225, %cst_55 [1] : vector<32x32xf32> to vector<32xf32>
    %227 = vector.shape_cast %226 : vector<32xf32> to vector<32x1xf32>
    %cst_56 = arith.constant 3.200000e+01 : f32
    %228 = vector.broadcast %cst_56 : f32 to vector<32x1xf32>
    %229 = arith.divf %227, %228 : vector<32x1xf32>
    %230 = vector.broadcast %222 : vector<32x1xf32> to vector<32x32xf32>
    %231 = arith.subf %218, %230 : vector<32x32xf32>
    %cst_57 = arith.constant 9.99999974E-6 : f32
    %232 = vector.broadcast %cst_57 : f32 to vector<32x1xf32>
    %233 = arith.addf %229, %232 : vector<32x1xf32>
    %234 = math.rsqrt %233 : vector<32x1xf32>
    %235 = vector.broadcast %234 : vector<32x1xf32> to vector<32x32xf32>
    %236 = arith.mulf %231, %235 : vector<32x32xf32>
    %237 = vector.broadcast %215 : vector<1x32xf32> to vector<32x32xf32>
    %238 = arith.mulf %236, %237 : vector<32x32xf32>
    %239 = vector.broadcast %217 : vector<1x32xf32> to vector<32x32xf32>
    %240 = arith.addf %238, %239 : vector<32x32xf32>
    %c1 = arith.constant 1 : index
    %c0_58 = arith.constant 0 : index
    %c0_59 = arith.constant 0 : index
    %241 = vector.load %arg3[%c1, %c0_58, %c0_59] : memref<2x32x96xf32, #tpu.memory_space<vmem>>, vector<1x32x96xf32>
    %242 = vector.shape_cast %241 : vector<1x32x96xf32> to vector<32x96xf32>
    %cst_60 = arith.constant dense<0.000000e+00> : vector<32x96xf32>
    %243 = tpu.matmul %240, %242, %cst_60 {dimension_numbers = #tpu.dot_dimension_numbers<[1], [0], [0], [1], [0, 0, 1, 1], [], []>} : vector<32x32xf32>, vector<32x96xf32>, vector<32x96xf32> -> vector<32x96xf32>
    %c1_61 = arith.constant 1 : index
    %c0_62 = arith.constant 0 : index
    %c0_63 = arith.constant 0 : index
    %244 = vector.load %arg4[%c1_61, %c0_62, %c0_63] : memref<2x1x96xf32, #tpu.memory_space<vmem>>, vector<1x1x96xf32>
    %245 = vector.shape_cast %244 : vector<1x1x96xf32> to vector<1x96xf32>
    %246 = vector.broadcast %245 : vector<1x96xf32> to vector<32x96xf32>
    %247 = arith.addf %243, %246 : vector<32x96xf32>
    %248 = vector.extract_strided_slice %247 {offsets = [0, 0], sizes = [32, 32], strides = [1, 1]} : vector<32x96xf32> to vector<32x32xf32>
    %249 = vector.extract_strided_slice %247 {offsets = [0, 32], sizes = [32, 32], strides = [1, 1]} : vector<32x96xf32> to vector<32x32xf32>
    %250 = vector.extract_strided_slice %247 {offsets = [0, 64], sizes = [32, 32], strides = [1, 1]} : vector<32x96xf32> to vector<32x32xf32>
    %251 = vector.extract_strided_slice %248 {offsets = [0, 0], sizes = [8, 32], strides = [1, 1]} : vector<32x32xf32> to vector<8x32xf32>
    %252 = vector.extract_strided_slice %248 {offsets = [0, 0], sizes = [8, 32], strides = [1, 1]} : vector<32x32xf32> to vector<8x32xf32>
    %253 = vector.extract_strided_slice %248 {offsets = [0, 0], sizes = [8, 32], strides = [1, 1]} : vector<32x32xf32> to vector<8x32xf32>
    %254 = vector.extract_strided_slice %248 {offsets = [0, 0], sizes = [8, 32], strides = [1, 1]} : vector<32x32xf32> to vector<8x32xf32>
    %255 = vector.extract_strided_slice %248 {offsets = [8, 0], sizes = [8, 32], strides = [1, 1]} : vector<32x32xf32> to vector<8x32xf32>
    %256 = vector.extract_strided_slice %248 {offsets = [8, 0], sizes = [8, 32], strides = [1, 1]} : vector<32x32xf32> to vector<8x32xf32>
    %257 = vector.extract_strided_slice %248 {offsets = [8, 0], sizes = [8, 32], strides = [1, 1]} : vector<32x32xf32> to vector<8x32xf32>
    %258 = vector.extract_strided_slice %248 {offsets = [8, 0], sizes = [8, 32], strides = [1, 1]} : vector<32x32xf32> to vector<8x32xf32>
    %259 = vector.extract_strided_slice %248 {offsets = [16, 0], sizes = [8, 32], strides = [1, 1]} : vector<32x32xf32> to vector<8x32xf32>
    %260 = vector.extract_strided_slice %248 {offsets = [16, 0], sizes = [8, 32], strides = [1, 1]} : vector<32x32xf32> to vector<8x32xf32>
    %261 = vector.extract_strided_slice %248 {offsets = [16, 0], sizes = [8, 32], strides = [1, 1]} : vector<32x32xf32> to vector<8x32xf32>
    %262 = vector.extract_strided_slice %248 {offsets = [16, 0], sizes = [8, 32], strides = [1, 1]} : vector<32x32xf32> to vector<8x32xf32>
    %263 = vector.extract_strided_slice %248 {offsets = [24, 0], sizes = [8, 32], strides = [1, 1]} : vector<32x32xf32> to vector<8x32xf32>
    %264 = vector.extract_strided_slice %248 {offsets = [24, 0], sizes = [8, 32], strides = [1, 1]} : vector<32x32xf32> to vector<8x32xf32>
    %265 = vector.extract_strided_slice %248 {offsets = [24, 0], sizes = [8, 32], strides = [1, 1]} : vector<32x32xf32> to vector<8x32xf32>
    %266 = vector.extract_strided_slice %248 {offsets = [24, 0], sizes = [8, 32], strides = [1, 1]} : vector<32x32xf32> to vector<8x32xf32>
    %267 = tpu.concatenate %251, %252, %253, %254, %255, %256, %257, %258, %259, %260, %261, %262, %263, %264, %265, %266 in 0 : vector<8x32xf32>, vector<8x32xf32>, vector<8x32xf32>, vector<8x32xf32>, vector<8x32xf32>, vector<8x32xf32>, vector<8x32xf32>, vector<8x32xf32>, vector<8x32xf32>, vector<8x32xf32>, vector<8x32xf32>, vector<8x32xf32>, vector<8x32xf32>, vector<8x32xf32>, vector<8x32xf32>, vector<8x32xf32> -> vector<128x32xf32>
    %268 = tpu.concatenate %249, %249, %249, %249 in 0 : vector<32x32xf32>, vector<32x32xf32>, vector<32x32xf32>, vector<32x32xf32> -> vector<128x32xf32>
    %269 = arith.mulf %267, %268 : vector<128x32xf32>
    %cst_64 = arith.constant dense<0.000000e+00> : vector<128x8xf32>
    %270 = tpu.matmul %269, %1, %cst_64 {dimension_numbers = #tpu.dot_dimension_numbers<[1], [0], [0], [1], [0, 0, 1, 1], [], []>} : vector<128x32xf32>, vector<32x8xf32>, vector<128x8xf32> -> vector<128x8xf32>
    %cst_65 = arith.constant 5.000000e-01 : f32
    %271 = vector.broadcast %cst_65 : f32 to vector<128x8xf32>
    %272 = arith.mulf %270, %271 : vector<128x8xf32>
    %273 = vector.extract_strided_slice %272 {offsets = [0, 0], sizes = [32, 8], strides = [1, 1]} : vector<128x8xf32> to vector<32x8xf32>
    %274 = vector.extract_strided_slice %273 {offsets = [0, 0], sizes = [8, 8], strides = [1, 1]} : vector<32x8xf32> to vector<8x8xf32>
    %275 = vector.extract_strided_slice %273 {offsets = [8, 0], sizes = [8, 8], strides = [1, 1]} : vector<32x8xf32> to vector<8x8xf32>
    %276 = vector.extract_strided_slice %273 {offsets = [16, 0], sizes = [8, 8], strides = [1, 1]} : vector<32x8xf32> to vector<8x8xf32>
    %277 = vector.extract_strided_slice %273 {offsets = [24, 0], sizes = [8, 8], strides = [1, 1]} : vector<32x8xf32> to vector<8x8xf32>
    %278 = arith.maximumf %274, %275 : vector<8x8xf32>
    %279 = arith.maximumf %278, %276 : vector<8x8xf32>
    %280 = arith.maximumf %279, %277 : vector<8x8xf32>
    %281 = arith.subf %274, %280 : vector<8x8xf32>
    %282 = math.exp %281 : vector<8x8xf32>
    %283 = arith.subf %275, %280 : vector<8x8xf32>
    %284 = math.exp %283 : vector<8x8xf32>
    %285 = arith.subf %276, %280 : vector<8x8xf32>
    %286 = math.exp %285 : vector<8x8xf32>
    %287 = arith.subf %277, %280 : vector<8x8xf32>
    %288 = math.exp %287 : vector<8x8xf32>
    %289 = arith.addf %282, %284 : vector<8x8xf32>
    %290 = arith.addf %289, %286 : vector<8x8xf32>
    %291 = arith.addf %290, %288 : vector<8x8xf32>
    %292 = tpu.reciprocal %291 {approx = true} : vector<8x8xf32> -> vector<8x8xf32>
    %293 = arith.mulf %282, %292 : vector<8x8xf32>
    %294 = arith.mulf %284, %292 : vector<8x8xf32>
    %295 = arith.mulf %286, %292 : vector<8x8xf32>
    %296 = arith.mulf %288, %292 : vector<8x8xf32>
    %297 = vector.extract_strided_slice %272 {offsets = [32, 0], sizes = [32, 8], strides = [1, 1]} : vector<128x8xf32> to vector<32x8xf32>
    %298 = vector.extract_strided_slice %297 {offsets = [0, 0], sizes = [8, 8], strides = [1, 1]} : vector<32x8xf32> to vector<8x8xf32>
    %299 = vector.extract_strided_slice %297 {offsets = [8, 0], sizes = [8, 8], strides = [1, 1]} : vector<32x8xf32> to vector<8x8xf32>
    %300 = vector.extract_strided_slice %297 {offsets = [16, 0], sizes = [8, 8], strides = [1, 1]} : vector<32x8xf32> to vector<8x8xf32>
    %301 = vector.extract_strided_slice %297 {offsets = [24, 0], sizes = [8, 8], strides = [1, 1]} : vector<32x8xf32> to vector<8x8xf32>
    %302 = arith.maximumf %298, %299 : vector<8x8xf32>
    %303 = arith.maximumf %302, %300 : vector<8x8xf32>
    %304 = arith.maximumf %303, %301 : vector<8x8xf32>
    %305 = arith.subf %298, %304 : vector<8x8xf32>
    %306 = math.exp %305 : vector<8x8xf32>
    %307 = arith.subf %299, %304 : vector<8x8xf32>
    %308 = math.exp %307 : vector<8x8xf32>
    %309 = arith.subf %300, %304 : vector<8x8xf32>
    %310 = math.exp %309 : vector<8x8xf32>
    %311 = arith.subf %301, %304 : vector<8x8xf32>
    %312 = math.exp %311 : vector<8x8xf32>
    %313 = arith.addf %306, %308 : vector<8x8xf32>
    %314 = arith.addf %313, %310 : vector<8x8xf32>
    %315 = arith.addf %314, %312 : vector<8x8xf32>
    %316 = tpu.reciprocal %315 {approx = true} : vector<8x8xf32> -> vector<8x8xf32>
    %317 = arith.mulf %306, %316 : vector<8x8xf32>
    %318 = arith.mulf %308, %316 : vector<8x8xf32>
    %319 = arith.mulf %310, %316 : vector<8x8xf32>
    %320 = arith.mulf %312, %316 : vector<8x8xf32>
    %321 = vector.extract_strided_slice %272 {offsets = [64, 0], sizes = [32, 8], strides = [1, 1]} : vector<128x8xf32> to vector<32x8xf32>
    %322 = vector.extract_strided_slice %321 {offsets = [0, 0], sizes = [8, 8], strides = [1, 1]} : vector<32x8xf32> to vector<8x8xf32>
    %323 = vector.extract_strided_slice %321 {offsets = [8, 0], sizes = [8, 8], strides = [1, 1]} : vector<32x8xf32> to vector<8x8xf32>
    %324 = vector.extract_strided_slice %321 {offsets = [16, 0], sizes = [8, 8], strides = [1, 1]} : vector<32x8xf32> to vector<8x8xf32>
    %325 = vector.extract_strided_slice %321 {offsets = [24, 0], sizes = [8, 8], strides = [1, 1]} : vector<32x8xf32> to vector<8x8xf32>
    %326 = arith.maximumf %322, %323 : vector<8x8xf32>
    %327 = arith.maximumf %326, %324 : vector<8x8xf32>
    %328 = arith.maximumf %327, %325 : vector<8x8xf32>
    %329 = arith.subf %322, %328 : vector<8x8xf32>
    %330 = math.exp %329 : vector<8x8xf32>
    %331 = arith.subf %323, %328 : vector<8x8xf32>
    %332 = math.exp %331 : vector<8x8xf32>
    %333 = arith.subf %324, %328 : vector<8x8xf32>
    %334 = math.exp %333 : vector<8x8xf32>
    %335 = arith.subf %325, %328 : vector<8x8xf32>
    %336 = math.exp %335 : vector<8x8xf32>
    %337 = arith.addf %330, %332 : vector<8x8xf32>
    %338 = arith.addf %337, %334 : vector<8x8xf32>
    %339 = arith.addf %338, %336 : vector<8x8xf32>
    %340 = tpu.reciprocal %339 {approx = true} : vector<8x8xf32> -> vector<8x8xf32>
    %341 = arith.mulf %330, %340 : vector<8x8xf32>
    %342 = arith.mulf %332, %340 : vector<8x8xf32>
    %343 = arith.mulf %334, %340 : vector<8x8xf32>
    %344 = arith.mulf %336, %340 : vector<8x8xf32>
    %345 = vector.extract_strided_slice %272 {offsets = [96, 0], sizes = [32, 8], strides = [1, 1]} : vector<128x8xf32> to vector<32x8xf32>
    %346 = vector.extract_strided_slice %345 {offsets = [0, 0], sizes = [8, 8], strides = [1, 1]} : vector<32x8xf32> to vector<8x8xf32>
    %347 = vector.extract_strided_slice %345 {offsets = [8, 0], sizes = [8, 8], strides = [1, 1]} : vector<32x8xf32> to vector<8x8xf32>
    %348 = vector.extract_strided_slice %345 {offsets = [16, 0], sizes = [8, 8], strides = [1, 1]} : vector<32x8xf32> to vector<8x8xf32>
    %349 = vector.extract_strided_slice %345 {offsets = [24, 0], sizes = [8, 8], strides = [1, 1]} : vector<32x8xf32> to vector<8x8xf32>
    %350 = arith.maximumf %346, %347 : vector<8x8xf32>
    %351 = arith.maximumf %350, %348 : vector<8x8xf32>
    %352 = arith.maximumf %351, %349 : vector<8x8xf32>
    %353 = arith.subf %346, %352 : vector<8x8xf32>
    %354 = math.exp %353 : vector<8x8xf32>
    %355 = arith.subf %347, %352 : vector<8x8xf32>
    %356 = math.exp %355 : vector<8x8xf32>
    %357 = arith.subf %348, %352 : vector<8x8xf32>
    %358 = math.exp %357 : vector<8x8xf32>
    %359 = arith.subf %349, %352 : vector<8x8xf32>
    %360 = math.exp %359 : vector<8x8xf32>
    %361 = arith.addf %354, %356 : vector<8x8xf32>
    %362 = arith.addf %361, %358 : vector<8x8xf32>
    %363 = arith.addf %362, %360 : vector<8x8xf32>
    %364 = tpu.reciprocal %363 {approx = true} : vector<8x8xf32> -> vector<8x8xf32>
    %365 = arith.mulf %354, %364 : vector<8x8xf32>
    %366 = arith.mulf %356, %364 : vector<8x8xf32>
    %367 = arith.mulf %358, %364 : vector<8x8xf32>
    %368 = arith.mulf %360, %364 : vector<8x8xf32>
    %369 = tpu.concatenate %293, %294, %295, %296, %317, %318, %319, %320, %341, %342, %343, %344, %365, %366, %367, %368 in 0 : vector<8x8xf32>, vector<8x8xf32>, vector<8x8xf32>, vector<8x8xf32>, vector<8x8xf32>, vector<8x8xf32>, vector<8x8xf32>, vector<8x8xf32>, vector<8x8xf32>, vector<8x8xf32>, vector<8x8xf32>, vector<8x8xf32>, vector<8x8xf32>, vector<8x8xf32>, vector<8x8xf32>, vector<8x8xf32> -> vector<128x8xf32>
    %370 = tpu.concatenate %250, %250, %250, %250 in 0 : vector<32x32xf32>, vector<32x32xf32>, vector<32x32xf32>, vector<32x32xf32> -> vector<128x32xf32>
    %cst_66 = arith.constant dense<0.000000e+00> : vector<128x32xf32>
    %371 = tpu.matmul %369, %2, %cst_66 {dimension_numbers = #tpu.dot_dimension_numbers<[1], [0], [0], [1], [0, 0, 1, 1], [], []>} : vector<128x8xf32>, vector<8x32xf32>, vector<128x32xf32> -> vector<128x32xf32>
    %372 = arith.mulf %371, %370 : vector<128x32xf32>
    %373 = vector.extract_strided_slice %372 {offsets = [0, 0], sizes = [8, 32], strides = [1, 1]} : vector<128x32xf32> to vector<8x32xf32>
    %374 = vector.extract_strided_slice %372 {offsets = [8, 0], sizes = [8, 32], strides = [1, 1]} : vector<128x32xf32> to vector<8x32xf32>
    %375 = arith.addf %373, %374 : vector<8x32xf32>
    %376 = vector.extract_strided_slice %372 {offsets = [16, 0], sizes = [8, 32], strides = [1, 1]} : vector<128x32xf32> to vector<8x32xf32>
    %377 = arith.addf %375, %376 : vector<8x32xf32>
    %378 = vector.extract_strided_slice %372 {offsets = [24, 0], sizes = [8, 32], strides = [1, 1]} : vector<128x32xf32> to vector<8x32xf32>
    %379 = arith.addf %377, %378 : vector<8x32xf32>
    %380 = vector.extract_strided_slice %372 {offsets = [32, 0], sizes = [8, 32], strides = [1, 1]} : vector<128x32xf32> to vector<8x32xf32>
    %381 = vector.extract_strided_slice %372 {offsets = [40, 0], sizes = [8, 32], strides = [1, 1]} : vector<128x32xf32> to vector<8x32xf32>
    %382 = arith.addf %380, %381 : vector<8x32xf32>
    %383 = vector.extract_strided_slice %372 {offsets = [48, 0], sizes = [8, 32], strides = [1, 1]} : vector<128x32xf32> to vector<8x32xf32>
    %384 = arith.addf %382, %383 : vector<8x32xf32>
    %385 = vector.extract_strided_slice %372 {offsets = [56, 0], sizes = [8, 32], strides = [1, 1]} : vector<128x32xf32> to vector<8x32xf32>
    %386 = arith.addf %384, %385 : vector<8x32xf32>
    %387 = vector.extract_strided_slice %372 {offsets = [64, 0], sizes = [8, 32], strides = [1, 1]} : vector<128x32xf32> to vector<8x32xf32>
    %388 = vector.extract_strided_slice %372 {offsets = [72, 0], sizes = [8, 32], strides = [1, 1]} : vector<128x32xf32> to vector<8x32xf32>
    %389 = arith.addf %387, %388 : vector<8x32xf32>
    %390 = vector.extract_strided_slice %372 {offsets = [80, 0], sizes = [8, 32], strides = [1, 1]} : vector<128x32xf32> to vector<8x32xf32>
    %391 = arith.addf %389, %390 : vector<8x32xf32>
    %392 = vector.extract_strided_slice %372 {offsets = [88, 0], sizes = [8, 32], strides = [1, 1]} : vector<128x32xf32> to vector<8x32xf32>
    %393 = arith.addf %391, %392 : vector<8x32xf32>
    %394 = vector.extract_strided_slice %372 {offsets = [96, 0], sizes = [8, 32], strides = [1, 1]} : vector<128x32xf32> to vector<8x32xf32>
    %395 = vector.extract_strided_slice %372 {offsets = [104, 0], sizes = [8, 32], strides = [1, 1]} : vector<128x32xf32> to vector<8x32xf32>
    %396 = arith.addf %394, %395 : vector<8x32xf32>
    %397 = vector.extract_strided_slice %372 {offsets = [112, 0], sizes = [8, 32], strides = [1, 1]} : vector<128x32xf32> to vector<8x32xf32>
    %398 = arith.addf %396, %397 : vector<8x32xf32>
    %399 = vector.extract_strided_slice %372 {offsets = [120, 0], sizes = [8, 32], strides = [1, 1]} : vector<128x32xf32> to vector<8x32xf32>
    %400 = arith.addf %398, %399 : vector<8x32xf32>
    %401 = tpu.concatenate %379, %386, %393, %400 in 0 : vector<8x32xf32>, vector<8x32xf32>, vector<8x32xf32>, vector<8x32xf32> -> vector<32x32xf32>
    %c1_67 = arith.constant 1 : index
    %c0_68 = arith.constant 0 : index
    %c0_69 = arith.constant 0 : index
    %402 = vector.load %arg5[%c1_67, %c0_68, %c0_69] : memref<2x32x32xf32, #tpu.memory_space<vmem>>, vector<1x32x32xf32>
    %403 = vector.shape_cast %402 : vector<1x32x32xf32> to vector<32x32xf32>
    %cst_70 = arith.constant dense<0.000000e+00> : vector<32x32xf32>
    %404 = tpu.matmul %401, %403, %cst_70 {dimension_numbers = #tpu.dot_dimension_numbers<[1], [0], [0], [1], [0, 0, 1, 1], [], []>} : vector<32x32xf32>, vector<32x32xf32>, vector<32x32xf32> -> vector<32x32xf32>
    %c1_71 = arith.constant 1 : index
    %c0_72 = arith.constant 0 : index
    %c0_73 = arith.constant 0 : index
    %405 = vector.load %arg6[%c1_71, %c0_72, %c0_73] : memref<2x1x32xf32, #tpu.memory_space<vmem>>, vector<1x1x32xf32>
    %406 = vector.shape_cast %405 : vector<1x1x32xf32> to vector<1x32xf32>
    %407 = vector.broadcast %406 : vector<1x32xf32> to vector<32x32xf32>
    %408 = arith.addf %404, %407 : vector<32x32xf32>
    %c1_74 = arith.constant 1 : index
    %c0_75 = arith.constant 0 : index
    %c0_76 = arith.constant 0 : index
    %409 = vector.load %arg7[%c1_74, %c0_75, %c0_76] : memref<2x1x32xf32, #tpu.memory_space<vmem>>, vector<1x1x32xf32>
    %410 = vector.shape_cast %409 : vector<1x1x32xf32> to vector<1x32xf32>
    %c1_77 = arith.constant 1 : index
    %c0_78 = arith.constant 0 : index
    %c0_79 = arith.constant 0 : index
    %411 = vector.load %arg8[%c1_77, %c0_78, %c0_79] : memref<2x1x32xf32, #tpu.memory_space<vmem>>, vector<1x1x32xf32>
    %412 = vector.shape_cast %411 : vector<1x1x32xf32> to vector<1x32xf32>
    %413 = arith.addf %240, %408 : vector<32x32xf32>
    %cst_80 = arith.constant dense<0.000000e+00> : vector<32xf32>
    %414 = vector.multi_reduction <add>, %413, %cst_80 [1] : vector<32x32xf32> to vector<32xf32>
    %415 = vector.shape_cast %414 : vector<32xf32> to vector<32x1xf32>
    %cst_81 = arith.constant 3.200000e+01 : f32
    %416 = vector.broadcast %cst_81 : f32 to vector<32x1xf32>
    %417 = arith.divf %415, %416 : vector<32x1xf32>
    %418 = vector.broadcast %417 : vector<32x1xf32> to vector<32x32xf32>
    %419 = arith.subf %413, %418 : vector<32x32xf32>
    %420 = arith.mulf %419, %419 : vector<32x32xf32>
    %cst_82 = arith.constant dense<0.000000e+00> : vector<32xf32>
    %421 = vector.multi_reduction <add>, %420, %cst_82 [1] : vector<32x32xf32> to vector<32xf32>
    %422 = vector.shape_cast %421 : vector<32xf32> to vector<32x1xf32>
    %cst_83 = arith.constant 3.200000e+01 : f32
    %423 = vector.broadcast %cst_83 : f32 to vector<32x1xf32>
    %424 = arith.divf %422, %423 : vector<32x1xf32>
    %425 = vector.broadcast %417 : vector<32x1xf32> to vector<32x32xf32>
    %426 = arith.subf %413, %425 : vector<32x32xf32>
    %cst_84 = arith.constant 9.99999974E-6 : f32
    %427 = vector.broadcast %cst_84 : f32 to vector<32x1xf32>
    %428 = arith.addf %424, %427 : vector<32x1xf32>
    %429 = math.rsqrt %428 : vector<32x1xf32>
    %430 = vector.broadcast %429 : vector<32x1xf32> to vector<32x32xf32>
    %431 = arith.mulf %426, %430 : vector<32x32xf32>
    %432 = vector.broadcast %410 : vector<1x32xf32> to vector<32x32xf32>
    %433 = arith.mulf %431, %432 : vector<32x32xf32>
    %434 = vector.broadcast %412 : vector<1x32xf32> to vector<32x32xf32>
    %435 = arith.addf %433, %434 : vector<32x32xf32>
    %c1_85 = arith.constant 1 : index
    %c0_86 = arith.constant 0 : index
    %c0_87 = arith.constant 0 : index
    %436 = vector.load %arg9[%c1_85, %c0_86, %c0_87] : memref<2x32x64xf32, #tpu.memory_space<vmem>>, vector<1x32x64xf32>
    %437 = vector.shape_cast %436 : vector<1x32x64xf32> to vector<32x64xf32>
    %cst_88 = arith.constant dense<0.000000e+00> : vector<32x64xf32>
    %438 = tpu.matmul %435, %437, %cst_88 {dimension_numbers = #tpu.dot_dimension_numbers<[1], [0], [0], [1], [0, 0, 1, 1], [], []>} : vector<32x32xf32>, vector<32x64xf32>, vector<32x64xf32> -> vector<32x64xf32>
    %c1_89 = arith.constant 1 : index
    %c0_90 = arith.constant 0 : index
    %c0_91 = arith.constant 0 : index
    %439 = vector.load %arg10[%c1_89, %c0_90, %c0_91] : memref<2x1x64xf32, #tpu.memory_space<vmem>>, vector<1x1x64xf32>
    %440 = vector.shape_cast %439 : vector<1x1x64xf32> to vector<1x64xf32>
    %441 = vector.broadcast %440 : vector<1x64xf32> to vector<32x64xf32>
    %442 = arith.addf %438, %441 : vector<32x64xf32>
    %cst_92 = arith.constant 0.000000e+00 : f32
    %443 = vector.broadcast %cst_92 : f32 to vector<32x64xf32>
    %444 = arith.maximumf %442, %443 : vector<32x64xf32>
    %c1_93 = arith.constant 1 : index
    %c0_94 = arith.constant 0 : index
    %c0_95 = arith.constant 0 : index
    %445 = vector.load %arg11[%c1_93, %c0_94, %c0_95] : memref<2x64x32xf32, #tpu.memory_space<vmem>>, vector<1x64x32xf32>
    %446 = vector.shape_cast %445 : vector<1x64x32xf32> to vector<64x32xf32>
    %cst_96 = arith.constant dense<0.000000e+00> : vector<32x32xf32>
    %447 = tpu.matmul %444, %446, %cst_96 {dimension_numbers = #tpu.dot_dimension_numbers<[1], [0], [0], [1], [0, 0, 1, 1], [], []>} : vector<32x64xf32>, vector<64x32xf32>, vector<32x32xf32> -> vector<32x32xf32>
    %c1_97 = arith.constant 1 : index
    %c0_98 = arith.constant 0 : index
    %c0_99 = arith.constant 0 : index
    %448 = vector.load %arg12[%c1_97, %c0_98, %c0_99] : memref<2x1x32xf32, #tpu.memory_space<vmem>>, vector<1x1x32xf32>
    %449 = vector.shape_cast %448 : vector<1x1x32xf32> to vector<1x32xf32>
    %450 = vector.broadcast %449 : vector<1x32xf32> to vector<32x32xf32>
    %451 = arith.addf %447, %450 : vector<32x32xf32>
    %c1_100 = arith.constant 1 : index
    %c0_101 = arith.constant 0 : index
    %c0_102 = arith.constant 0 : index
    %452 = vector.load %arg13[%c1_100, %c0_101, %c0_102] : memref<2x1x32xf32, #tpu.memory_space<vmem>>, vector<1x1x32xf32>
    %453 = vector.shape_cast %452 : vector<1x1x32xf32> to vector<1x32xf32>
    %c1_103 = arith.constant 1 : index
    %c0_104 = arith.constant 0 : index
    %c0_105 = arith.constant 0 : index
    %454 = vector.load %arg14[%c1_103, %c0_104, %c0_105] : memref<2x1x32xf32, #tpu.memory_space<vmem>>, vector<1x1x32xf32>
    %455 = vector.shape_cast %454 : vector<1x1x32xf32> to vector<1x32xf32>
    %456 = arith.addf %435, %451 : vector<32x32xf32>
    %cst_106 = arith.constant dense<0.000000e+00> : vector<32xf32>
    %457 = vector.multi_reduction <add>, %456, %cst_106 [1] : vector<32x32xf32> to vector<32xf32>
    %458 = vector.shape_cast %457 : vector<32xf32> to vector<32x1xf32>
    %cst_107 = arith.constant 3.200000e+01 : f32
    %459 = vector.broadcast %cst_107 : f32 to vector<32x1xf32>
    %460 = arith.divf %458, %459 : vector<32x1xf32>
    %461 = vector.broadcast %460 : vector<32x1xf32> to vector<32x32xf32>
    %462 = arith.subf %456, %461 : vector<32x32xf32>
    %463 = arith.mulf %462, %462 : vector<32x32xf32>
    %cst_108 = arith.constant dense<0.000000e+00> : vector<32xf32>
    %464 = vector.multi_reduction <add>, %463, %cst_108 [1] : vector<32x32xf32> to vector<32xf32>
    %465 = vector.shape_cast %464 : vector<32xf32> to vector<32x1xf32>
    %cst_109 = arith.constant 3.200000e+01 : f32
    %466 = vector.broadcast %cst_109 : f32 to vector<32x1xf32>
    %467 = arith.divf %465, %466 : vector<32x1xf32>
    %468 = vector.broadcast %460 : vector<32x1xf32> to vector<32x32xf32>
    %469 = arith.subf %456, %468 : vector<32x32xf32>
    %cst_110 = arith.constant 9.99999974E-6 : f32
    %470 = vector.broadcast %cst_110 : f32 to vector<32x1xf32>
    %471 = arith.addf %467, %470 : vector<32x1xf32>
    %472 = math.rsqrt %471 : vector<32x1xf32>
    %473 = vector.broadcast %472 : vector<32x1xf32> to vector<32x32xf32>
    %474 = arith.mulf %469, %473 : vector<32x32xf32>
    %475 = vector.broadcast %453 : vector<1x32xf32> to vector<32x32xf32>
    %476 = arith.mulf %474, %475 : vector<32x32xf32>
    %477 = vector.broadcast %455 : vector<1x32xf32> to vector<32x32xf32>
    %478 = arith.addf %476, %477 : vector<32x32xf32>
    %c0_111 = arith.constant 0 : index
    %c0_112 = arith.constant 0 : index
    %479 = vector.load %arg15[%c0_111, %c0_112] : memref<128x32xf32, #tpu.memory_space<vmem>>, vector<128x32xf32>
    %cst_113 = arith.constant 0.000000e+00 : f32
    %480 = vector.broadcast %cst_113 : f32 to vector<8x32xf32>
    %481 = vector.extract_strided_slice %478 {offsets = [0, 0], sizes = [8, 32], strides = [1, 1]} : vector<32x32xf32> to vector<8x32xf32>
    %482 = vector.extract_strided_slice %479 {offsets = [0, 0], sizes = [32, 32], strides = [1, 1]} : vector<128x32xf32> to vector<32x32xf32>
    %cst_114 = arith.constant dense<0.000000e+00> : vector<8x32xf32>
    %483 = tpu.matmul %481, %482, %cst_114 {dimension_numbers = #tpu.dot_dimension_numbers<[1], [0], [0], [1], [0, 0, 1, 1], [], []>} : vector<8x32xf32>, vector<32x32xf32>, vector<8x32xf32> -> vector<8x32xf32>
    %484 = arith.addf %480, %483 : vector<8x32xf32>
    %485 = vector.extract_strided_slice %478 {offsets = [8, 0], sizes = [8, 32], strides = [1, 1]} : vector<32x32xf32> to vector<8x32xf32>
    %486 = vector.extract_strided_slice %479 {offsets = [32, 0], sizes = [32, 32], strides = [1, 1]} : vector<128x32xf32> to vector<32x32xf32>
    %cst_115 = arith.constant dense<0.000000e+00> : vector<8x32xf32>
    %487 = tpu.matmul %485, %486, %cst_115 {dimension_numbers = #tpu.dot_dimension_numbers<[1], [0], [0], [1], [0, 0, 1, 1], [], []>} : vector<8x32xf32>, vector<32x32xf32>, vector<8x32xf32> -> vector<8x32xf32>
    %488 = arith.addf %484, %487 : vector<8x32xf32>
    %489 = vector.extract_strided_slice %478 {offsets = [16, 0], sizes = [8, 32], strides = [1, 1]} : vector<32x32xf32> to vector<8x32xf32>
    %490 = vector.extract_strided_slice %479 {offsets = [64, 0], sizes = [32, 32], strides = [1, 1]} : vector<128x32xf32> to vector<32x32xf32>
    %cst_116 = arith.constant dense<0.000000e+00> : vector<8x32xf32>
    %491 = tpu.matmul %489, %490, %cst_116 {dimension_numbers = #tpu.dot_dimension_numbers<[1], [0], [0], [1], [0, 0, 1, 1], [], []>} : vector<8x32xf32>, vector<32x32xf32>, vector<8x32xf32> -> vector<8x32xf32>
    %492 = arith.addf %488, %491 : vector<8x32xf32>
    %493 = vector.extract_strided_slice %478 {offsets = [24, 0], sizes = [8, 32], strides = [1, 1]} : vector<32x32xf32> to vector<8x32xf32>
    %494 = vector.extract_strided_slice %479 {offsets = [96, 0], sizes = [32, 32], strides = [1, 1]} : vector<128x32xf32> to vector<32x32xf32>
    %cst_117 = arith.constant dense<0.000000e+00> : vector<8x32xf32>
    %495 = tpu.matmul %493, %494, %cst_117 {dimension_numbers = #tpu.dot_dimension_numbers<[1], [0], [0], [1], [0, 0, 1, 1], [], []>} : vector<8x32xf32>, vector<32x32xf32>, vector<8x32xf32> -> vector<8x32xf32>
    %496 = arith.addf %492, %495 : vector<8x32xf32>
    %c0_118 = arith.constant 0 : index
    %c0_119 = arith.constant 0 : index
    %497 = vector.load %arg16[%c0_118, %c0_119] : memref<1x32xf32, #tpu.memory_space<vmem>>, vector<1x32xf32>
    %498 = vector.broadcast %497 : vector<1x32xf32> to vector<8x32xf32>
    %499 = arith.addf %496, %498 : vector<8x32xf32>
    %c0_120 = arith.constant 0 : index
    %c0_121 = arith.constant 0 : index
    %500 = vector.load %arg20[%c0_120, %c0_121] : memref<32x16xf32, #tpu.memory_space<vmem>>, vector<32x16xf32>
    %cst_122 = arith.constant dense<0.000000e+00> : vector<8x16xf32>
    %501 = tpu.matmul %499, %500, %cst_122 {dimension_numbers = #tpu.dot_dimension_numbers<[1], [0], [0], [1], [0, 0, 1, 1], [], []>} : vector<8x32xf32>, vector<32x16xf32>, vector<8x16xf32> -> vector<8x16xf32>
    %c0_123 = arith.constant 0 : index
    %c0_124 = arith.constant 0 : index
    %502 = vector.load %arg17[%c0_123, %c0_124] : memref<4x32xf32, #tpu.memory_space<vmem>>, vector<4x32xf32>
    %c0_125 = arith.constant 0 : index
    %c0_126 = arith.constant 0 : index
    %503 = vector.load %arg20[%c0_125, %c0_126] : memref<32x16xf32, #tpu.memory_space<vmem>>, vector<32x16xf32>
    %cst_127 = arith.constant dense<0.000000e+00> : vector<4x16xf32>
    %504 = tpu.matmul %502, %503, %cst_127 {dimension_numbers = #tpu.dot_dimension_numbers<[1], [0], [0], [1], [0, 0, 1, 1], [], []>} : vector<4x32xf32>, vector<32x16xf32>, vector<4x16xf32> -> vector<4x16xf32>
    %c0_128 = arith.constant 0 : index
    %c0_129 = arith.constant 0 : index
    %505 = vector.load %arg18[%c0_128, %c0_129] : memref<8x8xf32, #tpu.memory_space<vmem>>, vector<8x8xf32>
    %cst_130 = arith.constant dense<0.000000e+00> : vector<8x16xf32>
    %506 = tpu.matmul %505, %501, %cst_130 {dimension_numbers = #tpu.dot_dimension_numbers<[1], [0], [0], [1], [0, 0, 1, 1], [], []>} : vector<8x8xf32>, vector<8x16xf32>, vector<8x16xf32> -> vector<8x16xf32>
    %c0_131 = arith.constant 0 : index
    %c0_132 = arith.constant 0 : index
    %507 = vector.load %arg19[%c0_131, %c0_132] : memref<8x4xf32, #tpu.memory_space<vmem>>, vector<8x4xf32>
    %cst_133 = arith.constant dense<0.000000e+00> : vector<8x16xf32>
    %508 = tpu.matmul %507, %504, %cst_133 {dimension_numbers = #tpu.dot_dimension_numbers<[1], [0], [0], [1], [0, 0, 1, 1], [], []>} : vector<8x4xf32>, vector<4x16xf32>, vector<8x16xf32> -> vector<8x16xf32>
    %509 = arith.addf %506, %508 : vector<8x16xf32>
    %c0_134 = arith.constant 0 : index
    %c0_135 = arith.constant 0 : index
    %510 = vector.load %arg21[%c0_134, %c0_135] : memref<1x16xf32, #tpu.memory_space<vmem>>, vector<1x16xf32>
    %511 = vector.broadcast %510 : vector<1x16xf32> to vector<8x16xf32>
    %512 = arith.addf %509, %511 : vector<8x16xf32>
    %c0_136 = arith.constant 0 : index
    %c0_137 = arith.constant 0 : index
    %513 = vector.load %arg22[%c0_136, %c0_137] : memref<8x16xf32, #tpu.memory_space<vmem>>, vector<8x16xf32>
    tpu.vector_store %arg22[%c0_136, %c0_137], %512 {strides = array<i32>} : memref<8x16xf32, #tpu.memory_space<vmem>>, vector<8x16xf32>,
    return
  }
}

</mosaic_0001>

<bundles_post_ra>
// kernel: bridge_forward.1
= control target key start
LH: loop header
LB: loop body
LE: loop exit
PB: predicated region body
PF: predicated region fallthrough
CT: control target
= control target key end

     0   :  { %s4661_s0 = inlined_call_operand.vmem [shape: f32[32,32], index: 0, kind: input, shape index: {}]   ;;  %s4662_s1 = inlined_call_operand.vmem [shape: f32[32,8], index: 1, kind: input, shape index: {}]   ;;  %s4663_s2 = inlined_call_operand.vmem [shape: f32[8,32], index: 2, kind: input, shape index: {}]   ;;  %s4664_s3 = inlined_call_operand.vmem [shape: f32[2,32,96], index: 3, kind: input, shape index: {}]   ;;  %s4665_s4 = inlined_call_operand.vmem [shape: f32[2,1,96], index: 4, kind: input, shape index: {}]   ;;  %s4666_s5 = inlined_call_operand.vmem [shape: f32[2,32,32], index: 5, kind: input, shape index: {}]   ;;  %s4667_s6 = inlined_call_operand.vmem [shape: f32[2,1,32], index: 6, kind: input, shape index: {}]   ;;  %s4668_s7 = inlined_call_operand.vmem [shape: f32[2,1,32], index: 7, kind: input, shape index: {}]   ;;  %s4669_s8 = inlined_call_operand.vmem [shape: f32[2,1,32], index: 8, kind: input, shape index: {}]   ;;  %s4670_s9 = inlined_call_operand.vmem [shape: f32[2,32,64], index: 9, kind: input, shape index: {}]   ;;  %s4671_s10 = inlined_call_operand.vmem [shape: f32[2,1,64], index: 10, kind: input, shape index: {}]   ;;  %s4672_s11 = inlined_call_operand.vmem [shape: f32[2,64,32], index: 11, kind: input, shape index: {}]   ;;  %s4673_s12 = inlined_call_operand.vmem [shape: f32[2,1,32], index: 12, kind: input, shape index: {}]   ;;  %s4674_s13 = inlined_call_operand.vmem [shape: f32[2,1,32], index: 13, kind: input, shape index: {}]   ;;  %s4675_s14 = inlined_call_operand.vmem [shape: f32[2,1,32], index: 14, kind: input, shape index: {}]   ;;  %s4676_s15 = inlined_call_operand.vmem [shape: f32[128,32], index: 15, kind: input, shape index: {}]   ;;  %s4677_s16 = inlined_call_operand.vmem [shape: f32[1,32], index: 16, kind: input, shape index: {}]   ;;  %s4678_s17 = inlined_call_operand.vmem [shape: f32[4,32], index: 17, kind: input, shape index: {}]   ;;  %s4679_s18 = inlined_call_operand.vmem [shape: f32[8,8], index: 18, kind: input, shape index: {}]   ;;  %s4680_s19 = inlined_call_operand.vmem [shape: f32[8,4], index: 19, kind: input, shape index: {}]   ;;  %s4681_s20 = inlined_call_operand.vmem [shape: f32[32,16], index: 20, kind: input, shape index: {}]   ;;  %s4682_s21 = inlined_call_operand.vmem [shape: f32[1,16], index: 21, kind: input, shape index: {}]   ;;  %s4683_s22 = inlined_call_operand.hbm [shape: f32[8,16], index: 22, kind: output, shape index: {}]  }
   0x1   :  { %4692 = sst [smem:[#allocation5_spill]] %s4661_s0 }
   0x2   :  { %4693 = sst [smem:[#allocation6_spill]] %s4662_s1 }
   0x3   :  { %4694 = sst [smem:[#allocation7_spill]] %s4663_s2 }
   0x4   :  { %4695 = sst [smem:[#allocation8_spill]] %s4664_s3 }
   0x5   :  { %4696 = sst [smem:[#allocation9_spill]] %s4665_s4 }
   0x6   :  { %4697 = sst [smem:[#allocation10_spill]] %s4666_s5 }
   0x7   :  { %4698 = sst [smem:[#allocation11_spill]] %s4667_s6 }
   0x8   :  { %s4699_s29 = sld [smem:[#allocation8_spill]]  ;;  %vm92_vm0 = vcmask 261120   ;;  %s4700_s25 = sld [smem:[#allocation5_spill]] }
   0xe   :  { %v81_v0 = vld [vmem:[%s4699_s29] sm:$0xff]  ;;  %v82_v1 = vld [vmem:[%s4699_s29 + $0x8] sm:$0xff]  ;;  %v83_v2 = vld [vmem:[%s4699_s29 + $0x10] sm:$0xff] }
   0xf   :  { %v3718_v3 = vpack.c.bf16 %v82_v1, %v81_v0  ;;  %v84_v4 = vld [vmem:[%s4699_s29 + $0x18] sm:$0xff]  ;;  %v4128_v5 = vld [vmem:[%s4700_s25] sm:$0xff] }
  0x10   :  { %v3722_v6 = vpack.c.bf16 %v84_v4, %v83_v2  ;;  %3406 = vmatprep.mubr.msk.f32.mxu0 %vm92_vm0, %v4128_v5 }
  0x11   :  { %27 = vsyncpa [#allocation3], 0  ;;  %3719 = vmatprep.subr.bf16.mxu0 %v3718_v3  ;;  %v4135_v7 = vld [vmem:[%s4700_s25 + $0x8] sm:$0xff]  ;;  %v4140_v8 = vld [vmem:[%s4700_s25 + $0x10] sm:$0xff]  ;;  %s4701_s23 = sld [smem:[#allocation6_spill]]  ;;  %s4702_s3 = sld [smem:[#allocation9_spill]] }
  0x12   :  { %3721 = vmatpush3.bf16.msra.mxu0 %v3718_v3  ;;  %v4149_v9 = vld [vmem:[%s4700_s25 + $0x18] sm:$0xff]  ;;  %s3992_s28 = smov 96   ;;  %s4690_s30 = smov 64   ;;  %vm523_vm1 = vcmask 64512   ;;  %vm1071_vm2 = vcmask 523264   ;;  %vm3995_vm3 = vmmov 0  }
  0x13   :  { %3723 = vmatprep.subr.bf16.mxu0 %v3722_v6  ;;  %s4704_s24 = sld [smem:[#allocation10_spill]]  ;;  %s4705_s1 = sld [smem:[#allocation11_spill]]  ;;  %vm2896_vm4 = vcmask 1043456   ;;  %vm2892_vm5 = vcmask 31744   ;;  %vm3051_vm6 = vcmask 130048  }
  0x14   :  { %s4706_s27 = smov 64  }
  0x16   :  { %3725 = vmatpush3.bf16.msra.mxu0 %v3722_v6 }
  0x17   :  { %v76_v10 = vld [vmem:[%s4701_s23] sm:$0xff]  ;;  %v77_v11 = vld [vmem:[%s4701_s23 + $0x8] sm:$0xff]  ;;  %v78_v13 = vld [vmem:[%s4701_s23 + $0x10] sm:$0xff] }
  0x18   :  { %v4159_v12 = vpack.c.bf16 %v77_v11, %v76_v10  ;;  %v79_v14 = vld [vmem:[%s4701_s23 + $0x18] sm:$0xff]  ;;  %v3067_v16 = vld [vmem:[%s4702_s3] ss:$0 sm:$0xff]  ;;  %s4703_s23 = sld [smem:[#allocation7_spill]] }
  0x19   :  { %3407 = vmatmul.mubr.msk.f32.vlgmr.msra.gmra.mrb[0].mxu0 %vm92_vm0, %v4135_v7  ;;  %v4169_v15 = vpack.c.bf16 %v79_v14, %v78_v13 }
  0x1a   :  { %3409 = vmatprep.mubr.msk.f32.mxu0 %vm92_vm0, %v4140_v8  ;;  %3727 = vmatprep.subr.bf16.mxu1 %v4159_v12 }
  0x1b   :  { %3729 = vmatpush3.bf16.msra.mxu1 %v4159_v12 }
  0x1c   :  { %3731 = vmatprep.subr.bf16.mxu1 %v4169_v15 }
  0x1d   :  { %3410 = vmatmul.mubr.msk.f32.gmra.mrb[2].mxu0 %vm92_vm0, %v4149_v9 }
  0x1e   :  { %v4203_v45 = vld [vmem:[%s4703_s23] sm:$0xff] }
  0x1f   :  { %3733 = vmatpush3.bf16.msra.mxu1 %v4169_v15  ;;  %3444 = vmatprep.subr.mxu0 %v4203_v45 }
  0x20   :  { %3445 = vmatpush3.msra.mxu0 %v4203_v45 }
  0xec   :  { %v3408_v17 = vpop.f32.mrb[0].mxu0 }
  0xed   :  { %v171_v18 = vpop.f32.mrb[1].mxu0  ;;  %v177_v22 = vadd.f32 %v3408_v17, %v3067_v16 }
  0xee   :  { %v172_v19 = vadd.f32 %v3067_v16, %v171_v18 }
  0xf0   :  { %v3411_v20 = vpop.f32.mrb[2].mxu0  ;;  %194 = vrot.lane.b32.xlu0 %v172_v19, %s3992_s28 }
  0xf1   :  { %v181_v21 = vpop.f32.mrb[3].mxu0  ;;  %v187_v24 = vadd.f32 %v3411_v20, %v3067_v16 }
  0xf2   :  { %v182_v23 = vadd.f32 %v3067_v16, %v181_v21 }
  0xf4   :  { %198 = vrot.lane.b32.xlu1 %v182_v23, %s3992_s28  ;;  %196 = vrot.lane.b32.xlu0 %v177_v22, %s3992_s28 }
  0xf8   :  { %200 = vrot.lane.b32.xlu1 %v187_v24, %s3992_s28  ;;  %717 = vrot.lane.b32.xlu0 %v172_v19, %s4690_s30 }
  0xfc   :  { %719 = vrot.lane.b32.xlu1 %v177_v22, %s4690_s30  ;;  %721 = vrot.lane.b32.xlu0 %v182_v23, %s4690_s30 }
 0x100   :  { %723 = vrot.lane.b32.xlu1 %v187_v24, %s4690_s30 }
 0x162   :  { %v195_v25 = vpop.permute.xlu0 %194 }
 0x163   :  { %v206_v26 = vmul.f32 %v195_v25, %v172_v19  ;;  %v210_v33 = vmul.f32 %v195_v25, %v177_v22  ;;  %v214_v37 = vmul.f32 %v195_v25, %v182_v23  ;;  %v218_v41 = vmul.f32 %v195_v25, %v187_v24 }
 0x165   :  { %3420 = vmatprep.mubr.msk.f32.mxu1 %vm92_vm0, %v206_v26 }
 0x166   :  { %v199_v27 = vpop.permute.xlu1 %198  ;;  %v197_v28 = vpop.permute.xlu0 %196 }
 0x167   :  { %v208_v29 = vmul.f32 %v199_v27, %v172_v19  ;;  %v207_v30 = vmul.f32 %v197_v28, %v172_v19  ;;  %v211_v34 = vmul.f32 %v197_v28, %v177_v22  ;;  %v212_v35 = vmul.f32 %v199_v27, %v177_v22 }
 0x168   :  { %v215_v38 = vmul.f32 %v197_v28, %v182_v23  ;;  %v216_v39 = vmul.f32 %v199_v27, %v182_v23  ;;  %v219_v42 = vmul.f32 %v197_v28, %v187_v24  ;;  %v220_v43 = vmul.f32 %v199_v27, %v187_v24 }
 0x169   :  { %3421 = vmatmul.mubr.msk.f32.vlgmr.msra.gmra.mrb[0].mxu1 %vm92_vm0, %v207_v30 }
 0x16a   :  { %v201_v31 = vpop.permute.xlu1 %200  ;;  %3423 = vmatprep.mubr.msk.f32.mxu1 %vm92_vm0, %v208_v29 }
 0x16b   :  { %v209_v32 = vmul.f32 %v201_v31, %v172_v19  ;;  %v213_v36 = vmul.f32 %v201_v31, %v177_v22  ;;  %v217_v40 = vmul.f32 %v201_v31, %v182_v23  ;;  %v221_v44 = vmul.f32 %v201_v31, %v187_v24 }
 0x16d   :  { %3424 = vmatmul.mubr.msk.f32.gmra.mrb[2].mxu1 %vm92_vm0, %v209_v32 }
 0x16e   :  { %3426 = vmatprep.mubr.msk.f32.mxu1 %vm92_vm0, %v210_v33 }
 0x171   :  { %3427 = vmatmul.mubr.msk.f32.gmra.mrb[4].mxu1 %vm92_vm0, %v211_v34 }
 0x172   :  { %3429 = vmatprep.mubr.msk.f32.mxu1 %vm92_vm0, %v212_v35 }
 0x175   :  { %3430 = vmatmul.mubr.msk.f32.gmra.mrb[6].mxu1 %vm92_vm0, %v213_v36 }
 0x176   :  { %3432 = vmatprep.mubr.msk.f32.mxu1 %vm92_vm0, %v214_v37 }
 0x179   :  { %3433 = vmatmul.mubr.msk.f32.gmra.mrb[8].mxu1 %vm92_vm0, %v215_v38 }
 0x17a   :  { %3435 = vmatprep.mubr.msk.f32.mxu1 %vm92_vm0, %v216_v39 }
 0x17d   :  { %3436 = vmatmul.mubr.msk.f32.gmra.mrb[10].mxu1 %vm92_vm0, %v217_v40 }
 0x17e   :  { %3438 = vmatprep.mubr.msk.f32.mxu1 %vm92_vm0, %v218_v41 }
 0x181   :  { %3439 = vmatmul.mubr.msk.f32.gmra.mrb[12].mxu1 %vm92_vm0, %v219_v42 }
 0x182   :  { %3441 = vmatprep.mubr.msk.f32.mxu1 %vm92_vm0, %v220_v43 }
 0x185   :  { %3442 = vmatmul.mubr.msk.f32.gmra.mrb[14].mxu1 %vm92_vm0, %v221_v44 }
 0x23c   :  { %v3422_v46 = vpop.f32.mrb[0].mxu1 }
 0x23d   :  { %v416_v47 = vmul.f32 0.5, %v3422_v46  ;;  %v336_v48 = vpop.f32.mrb[1].mxu1 }
 0x23e   :  { %v415_v49 = vmul.f32 0.5, %v336_v48 }
 0x240   :  { %v431_v50 = vmax.f32 %v415_v49, %v416_v47  ;;  %v3425_v51 = vpop.f32.mrb[2].mxu1 }
 0x241   :  { %v346_v52 = vpop.f32.mrb[3].mxu1  ;;  %v418_v54 = vmul.f32 0.5, %v3425_v51 }
 0x242   :  { %v417_v53 = vmul.f32 0.5, %v346_v52 }
 0x244   :  { %v432_v55 = vmax.f32 %v431_v50, %v417_v53  ;;  %v3428_v56 = vpop.f32.mrb[4].mxu1 }
 0x245   :  { %v420_v57 = vmul.f32 0.5, %v3428_v56  ;;  %v356_v58 = vpop.f32.mrb[5].mxu1 }
 0x246   :  { %v433_v59 = vmax.f32 %v432_v55, %v418_v54  ;;  %v419_v60 = vmul.f32 0.5, %v356_v58 }
 0x248   :  { %v434_v61 = vsub.f32 %v415_v49, %v433_v59  ;;  %v437_v62 = vsub.f32 %v416_v47, %v433_v59  ;;  %v440_v63 = vsub.f32 %v417_v53, %v433_v59  ;;  %v443_v0 = vsub.f32 %v418_v54, %v433_v59  ;;  %v3431_v1 = vpop.f32.mrb[6].mxu1 }
 0x249   :  { %v454_v2 = vmax.f32 %v419_v60, %v420_v57  ;;  %v366_v3 = vpop.f32.mrb[7].mxu1  ;;  %v422_v16 = vmul.f32 0.5, %v3431_v1 }
 0x24a   :  { %v435_v4 = vmul.f32 1.442695, %v434_v61  ;;  %v438_v6 = vmul.f32 1.442695, %v437_v62  ;;  %v441_v10 = vmul.f32 1.442695, %v440_v63 }
 0x24b   :  { %v421_v11 = vmul.f32 0.5, %v366_v3  ;;  %v444_v13 = vmul.f32 1.442695, %v443_v0 }
 0x24c   :  { %3856 = vpow2.f32 %v435_v4  ;;  %v3434_v14 = vpop.f32.mrb[8].mxu1 }
 0x24d   :  { %3858 = vpow2.f32 %v438_v6  ;;  %v455_v17 = vmax.f32 %v454_v2, %v421_v11  ;;  %v424_v18 = vmul.f32 0.5, %v3434_v14  ;;  %v376_v19 = vpop.f32.mrb[9].mxu1 }
 0x24e   :  { %v423_v20 = vmul.f32 0.5, %v376_v19  ;;  %3860 = vpow2.f32 %v441_v10 }
 0x24f   :  { %v456_v21 = vmax.f32 %v455_v17, %v422_v16  ;;  %3862 = vpow2.f32 %v444_v13 }
 0x250   :  { %v477_v22 = vmax.f32 %v423_v20, %v424_v18  ;;  %v3437_v23 = vpop.f32.mrb[10].mxu1 }
 0x251   :  { %v457_v24 = vsub.f32 %v419_v60, %v456_v21  ;;  %v460_v25 = vsub.f32 %v420_v57, %v456_v21  ;;  %v463_v26 = vsub.f32 %v421_v11, %v456_v21  ;;  %v466_v27 = vsub.f32 %v422_v16, %v456_v21  ;;  %v386_v28 = vpop.f32.mrb[11].mxu1 }
 0x252   :  { %v425_v29 = vmul.f32 0.5, %v386_v28  ;;  %v426_v33 = vmul.f32 0.5, %v3437_v23 }
 0x253   :  { %v458_v30 = vmul.f32 1.442695, %v457_v24  ;;  %v461_v31 = vmul.f32 1.442695, %v460_v25  ;;  %v464_v32 = vmul.f32 1.442695, %v463_v26 }
 0x254   :  { %v478_v34 = vmax.f32 %v477_v22, %v425_v29  ;;  %v3440_v35 = vpop.f32.mrb[12].mxu1  ;;  %v467_v36 = vmul.f32 1.442695, %v466_v27 }
 0x255   :  { %3864 = vpow2.f32 %v458_v30  ;;  %v428_v37 = vmul.f32 0.5, %v3440_v35  ;;  %v396_v38 = vpop.f32.mrb[13].mxu1 }
 0x256   :  { %v3857_v39 = vpop.eup %3856  ;;  %3866 = vpow2.f32 %v461_v31  ;;  %v479_v40 = vmax.f32 %v478_v34, %v426_v33  ;;  %v427_v41 = vmul.f32 0.5, %v396_v38 }
 0x257   :  { %v3859_v42 = vpop.eup %3858  ;;  %3868 = vpow2.f32 %v464_v32 }
 0x258   :  { %v446_v43 = vadd.f32 %v3859_v42, %v3857_v39  ;;  %v480_v44 = vsub.f32 %v423_v20, %v479_v40  ;;  %v483_v46 = vsub.f32 %v424_v18, %v479_v40  ;;  %v3443_v47 = vpop.f32.mrb[14].mxu1  ;;  %v3861_v48 = vpop.eup %3860  ;;  %3870 = vpow2.f32 %v467_v36 }
 0x259   :  { %v486_v49 = vsub.f32 %v425_v29, %v479_v40  ;;  %v489_v50 = vsub.f32 %v426_v33, %v479_v40  ;;  %v500_v51 = vmax.f32 %v427_v41, %v428_v37  ;;  %v406_v52 = vpop.f32.mrb[15].mxu1  ;;  %v3863_v53 = vpop.eup %3862  ;;  %v430_v60 = vmul.f32 0.5, %v3443_v47 }
 0x25a   :  { %v447_v54 = vadd.f32 %v3861_v48, %v446_v43  ;;  %v481_v55 = vmul.f32 1.442695, %v480_v44  ;;  %v484_v56 = vmul.f32 1.442695, %v483_v46  ;;  %v429_v57 = vmul.f32 0.5, %v406_v52 }
 0x25b   :  { %v487_v58 = vmul.f32 1.442695, %v486_v49  ;;  %v490_v62 = vmul.f32 1.442695, %v489_v50 }
 0x25c   :  { %v448_v59 = vadd.f32 %v3863_v53, %v447_v54  ;;  %3872 = vpow2.f32 %v481_v55  ;;  %v501_v61 = vmax.f32 %v500_v51, %v429_v57 }
 0x25d   :  { %3874 = vpow2.f32 %v484_v56  ;;  %v757_v56 = vld [vmem:[%s4704_s24] sm:$0xff] }
 0x25e   :  { %3876 = vrcp.f32 %v448_v59  ;;  %v502_v63 = vmax.f32 %v501_v61, %v430_v60  ;;  %v759_v59 = vld [vmem:[%s4704_s24 + $0x10] sm:$0xff] }
 0x25f   :  { %v3865_v0 = vpop.eup %3864  ;;  %3878 = vpow2.f32 %v487_v58 }
 0x260   :  { %v3867_v1 = vpop.eup %3866  ;;  %v503_v2 = vsub.f32 %v427_v41, %v502_v63  ;;  %v506_v3 = vsub.f32 %v428_v37, %v502_v63  ;;  %v509_v4 = vsub.f32 %v429_v57, %v502_v63  ;;  %3880 = vpow2.f32 %v490_v62  ;;  %v758_v57 = vld [vmem:[%s4704_s24 + $0x8] sm:$0xff]  ;;  %v718_v62 = vpop.permute.xlu0 %717 }
 0x261   :  { %v469_v6 = vadd.f32 %v3867_v1, %v3865_v0  ;;  %v512_v10 = vsub.f32 %v430_v60, %v502_v63  ;;  %v3869_v11 = vpop.eup %3868  ;;  %v3734_v58 = vpack.c.bf16 %v758_v57, %v757_v56  ;;  %v760_v60 = vld [vmem:[%s4704_s24 + $0x18] sm:$0xff]  ;;  %v720_v63 = vpop.permute.xlu1 %719 }
 0x262   :  { %v504_v13 = vmul.f32 1.442695, %v503_v2  ;;  %v507_v14 = vmul.f32 1.442695, %v506_v3  ;;  %v510_v16 = vmul.f32 1.442695, %v509_v4  ;;  %v3871_v17 = vpop.eup %3870  ;;  %v3738_v61 = vpack.c.bf16 %v760_v60, %v759_v59 }
 0x263   :  { %v470_v18 = vadd.f32 %v3869_v11, %v469_v6  ;;  %v513_v19 = vmul.f32 1.442695, %v512_v10  ;;  %3735 = vmatprep.subr.bf16.mxu1 %v3734_v58 }
 0x264   :  { %3882 = vpow2.f32 %v504_v13  ;;  %3737 = vmatpush3.bf16.msra.mxu1 %v3734_v58  ;;  %v722_v10 = vpop.permute.xlu0 %721 }
 0x265   :  { %v471_v20 = vadd.f32 %v3871_v17, %v470_v18  ;;  %3884 = vpow2.f32 %v507_v14  ;;  %3739 = vmatprep.subr.bf16.mxu1 %v3738_v61  ;;  %v724_v14 = vpop.permute.xlu1 %723 }
 0x266   :  { %v3873_v21 = vpop.eup %3872  ;;  %3886 = vpow2.f32 %v510_v16 }
 0x267   :  { %v3875_v22 = vpop.eup %3874  ;;  %3888 = vrcp.f32 %v471_v20 }
 0x268   :  { %v3877_v23 = vpop.eup %3876  ;;  %v492_v24 = vadd.f32 %v3875_v22, %v3873_v21  ;;  %3890 = vpow2.f32 %v513_v19  ;;  %3741 = vmatpush3.bf16.msra.mxu1 %v3738_v61 }
 0x269   :  { %v3879_v25 = vpop.eup %3878  ;;  %v450_v26 = vmul.f32 %v3877_v23, %v3857_v39  ;;  %v451_v27 = vmul.f32 %v3877_v23, %v3859_v42  ;;  %v452_v28 = vmul.f32 %v3877_v23, %v3861_v48  ;;  %v453_v29 = vmul.f32 %v3877_v23, %v3863_v53 }
 0x26a   :  { %v493_v30 = vadd.f32 %v3879_v25, %v492_v24  ;;  %v3881_v31 = vpop.eup %3880 }
 0x26b   :  { %3446 = vmatprep.mubr.msk.f32.mxu0 %vm523_vm1, %v450_v26 }
 0x26c   :  { %v494_v32 = vadd.f32 %v3881_v31, %v493_v30  ;;  %3447 = vmatmul.mubr.msk.f32.vlgmr.msra.gmra.mrb[4].mxu0 %vm523_vm1, %v451_v27 }
 0x26d   :  { %3449 = vmatprep.mubr.msk.f32.mxu0 %vm523_vm1, %v452_v28 }
 0x26e   :  { %v3883_v33 = vpop.eup %3882  ;;  %3892 = vrcp.f32 %v494_v32 }
 0x26f   :  { %v3885_v34 = vpop.eup %3884 }
 0x270   :  { %v3887_v35 = vpop.eup %3886  ;;  %v515_v36 = vadd.f32 %v3885_v34, %v3883_v33  ;;  %3450 = vmatmul.mubr.msk.f32.gmra.mrb[6].mxu0 %vm523_vm1, %v453_v29 }
 0x271   :  { %v3889_v37 = vpop.eup %3888 }
 0x272   :  { %v3891_v38 = vpop.eup %3890  ;;  %v516_v39 = vadd.f32 %v3887_v35, %v515_v36  ;;  %v473_v40 = vmul.f32 %v3889_v37, %v3865_v0  ;;  %v474_v41 = vmul.f32 %v3889_v37, %v3867_v1  ;;  %v475_v42 = vmul.f32 %v3889_v37, %v3869_v11 }
 0x273   :  { %v476_v43 = vmul.f32 %v3889_v37, %v3871_v17 }
 0x274   :  { %v517_v44 = vadd.f32 %v3891_v38, %v516_v39  ;;  %3452 = vmatprep.mubr.msk.f32.mxu0 %vm523_vm1, %v473_v40 }
 0x275   :  { %3453 = vmatmul.mubr.msk.f32.gmra.mrb[8].mxu0 %vm523_vm1, %v474_v41 }
 0x276   :  { %3894 = vrcp.f32 %v517_v44  ;;  %3455 = vmatprep.mubr.msk.f32.mxu0 %vm523_vm1, %v475_v42 }
 0x278   :  { %v3893_v46 = vpop.eup %3892 }
 0x279   :  { %3456 = vmatmul.mubr.msk.f32.gmra.mrb[10].mxu0 %vm523_vm1, %v476_v43  ;;  %v496_v47 = vmul.f32 %v3893_v46, %v3873_v21  ;;  %v497_v48 = vmul.f32 %v3893_v46, %v3875_v22  ;;  %v498_v49 = vmul.f32 %v3893_v46, %v3879_v25  ;;  %v499_v50 = vmul.f32 %v3893_v46, %v3881_v31 }
 0x27b   :  { %3458 = vmatprep.mubr.msk.f32.mxu0 %vm523_vm1, %v496_v47 }
 0x27d   :  { %3459 = vmatmul.mubr.msk.f32.gmra.mrb[12].mxu0 %vm523_vm1, %v497_v48 }
 0x27e   :  { %3461 = vmatprep.mubr.msk.f32.mxu0 %vm523_vm1, %v498_v49 }
 0x280   :  { %v3895_v51 = vpop.eup %3894 }
 0x281   :  { %3462 = vmatmul.mubr.msk.f32.gmra.mrb[14].mxu0 %vm523_vm1, %v499_v50  ;;  %v519_v52 = vmul.f32 %v3895_v51, %v3883_v33  ;;  %v520_v53 = vmul.f32 %v3895_v51, %v3885_v34  ;;  %v521_v54 = vmul.f32 %v3895_v51, %v3887_v35  ;;  %v522_v55 = vmul.f32 %v3895_v51, %v3891_v38 }
 0x283   :  { %3464 = vmatprep.mubr.msk.f32.mxu0 %vm523_vm1, %v519_v52 }
 0x285   :  { %3465 = vmatmul.mubr.msk.f32.gmra.mrb[16].mxu0 %vm523_vm1, %v520_v53  ;;  %v3104_v53 = vld [vmem:[%s4705_s1] ss:$0 sm:$0xff] }
 0x286   :  { %3467 = vmatprep.mubr.msk.f32.mxu0 %vm523_vm1, %v521_v54 }
 0x289   :  { %3468 = vmatmul.mubr.msk.f32.gmra.mrb[18].mxu0 %vm523_vm1, %v522_v55 }
 0x33f   :  { %v3448_v0 = vpop.f32.mrb[4].mxu0 }
 0x340   :  { %v730_v1 = vmul.f32 %v3448_v0, %v720_v63  ;;  %v638_v2 = vpop.f32.mrb[5].mxu0 }
 0x341   :  { %v729_v3 = vmul.f32 %v718_v62, %v638_v2 }
 0x343   :  { %v745_v4 = vadd.f32 %v730_v1, %v729_v3  ;;  %v3451_v6 = vpop.f32.mrb[6].mxu0 }
 0x344   :  { %v648_v11 = vpop.f32.mrb[7].mxu0  ;;  %v732_v16 = vmul.f32 %v3451_v6, %v724_v14 }
 0x345   :  { %v731_v13 = vmul.f32 %v722_v10, %v648_v11 }
 0x347   :  { %v746_v17 = vadd.f32 %v745_v4, %v731_v13 }
 0x348   :  { %v3454_v18 = vpop.f32.mrb[8].mxu0 }
 0x349   :  { %v747_v19 = vadd.f32 %v746_v17, %v732_v16  ;;  %v734_v20 = vmul.f32 %v3454_v18, %v720_v63  ;;  %v658_v21 = vpop.f32.mrb[9].mxu0 }
 0x34a   :  { %v733_v22 = vmul.f32 %v718_v62, %v658_v21 }
 0x34b   :  { %3478 = vmatprep.mubr.msk.f32.mxu1 %vm92_vm0, %v747_v19 }
 0x34c   :  { %v748_v23 = vadd.f32 %v734_v20, %v733_v22  ;;  %v3457_v24 = vpop.f32.mrb[10].mxu0 }
 0x34d   :  { %v668_v25 = vpop.f32.mrb[11].mxu0  ;;  %v736_v27 = vmul.f32 %v3457_v24, %v724_v14 }
 0x34e   :  { %v735_v26 = vmul.f32 %v722_v10, %v668_v25 }
 0x350   :  { %v749_v28 = vadd.f32 %v748_v23, %v735_v26  ;;  %v3460_v29 = vpop.f32.mrb[12].mxu0 }
 0x351   :  { %v738_v30 = vmul.f32 %v3460_v29, %v720_v63  ;;  %v678_v31 = vpop.f32.mrb[13].mxu0  ;;  %v945_v29 = vld [vmem:[%s4670_s9 + $0x8] sm:$0xff] }
 0x352   :  { %v750_v32 = vadd.f32 %v749_v28, %v736_v27  ;;  %v737_v33 = vmul.f32 %v718_v62, %v678_v31  ;;  %v944_v28 = vld [vmem:[%s4670_s9] sm:$0xff]  ;;  %v946_v31 = vld [vmem:[%s4670_s9 + $0x10] sm:$0xff] }
 0x354   :  { %v751_v34 = vadd.f32 %v738_v30, %v737_v33  ;;  %v3463_v35 = vpop.f32.mrb[14].mxu0  ;;  %3479 = vmatmul.mubr.msk.f32.vlgmr.msra.gmra.mrb[16].mxu1 %vm92_vm0, %v750_v32  ;;  %v3742_v30 = vpack.c.bf16 %v945_v29, %v944_v28  ;;  %v947_v32 = vld [vmem:[%s4670_s9 + $0x18] sm:$0xff]  ;;  %v3116_v28 = vld [vmem:[%s4673_s12] ss:$0 sm:$0xff] }
 0x355   :  { %v688_v36 = vpop.f32.mrb[15].mxu0  ;;  %v740_v38 = vmul.f32 %v3463_v35, %v724_v14  ;;  %v3746_v33 = vpack.c.bf16 %v947_v32, %v946_v31  ;;  %v1057_v35 = vld [vmem:[%s4672_s11 + $0x8] sm:$0xff] }
 0x356   :  { %v739_v37 = vmul.f32 %v722_v10, %v688_v36  ;;  %3743 = vmatprep.subr.bf16.mxu0 %v3742_v30  ;;  %v1058_v36 = vld [vmem:[%s4672_s11 + $0x10] sm:$0xff] }
 0x357   :  { %3745 = vmatpush3.bf16.msra.mxu0 %v3742_v30 }
 0x358   :  { %v752_v39 = vadd.f32 %v751_v34, %v739_v37  ;;  %v3466_v40 = vpop.f32.mrb[16].mxu0  ;;  %3747 = vmatprep.subr.bf16.mxu0 %v3746_v33  ;;  %v1056_v34 = vld [vmem:[%s4672_s11] sm:$0xff] }
 0x359   :  { %v742_v41 = vmul.f32 %v3466_v40, %v720_v63  ;;  %v698_v42 = vpop.f32.mrb[17].mxu0  ;;  %v3750_v37 = vpack.c.bf16 %v1057_v35, %v1056_v34  ;;  %v1060_v40 = vld [vmem:[%s4672_s11 + $0x20] sm:$0xff] }
 0x35a   :  { %v753_v43 = vadd.f32 %v752_v39, %v740_v38  ;;  %v741_v44 = vmul.f32 %v718_v62, %v698_v42  ;;  %v1059_v38 = vld [vmem:[%s4672_s11 + $0x18] sm:$0xff] }
 0x35b   :  { %3749 = vmatpush3.bf16.msra.mxu0 %v3746_v33  ;;  %v3754_v39 = vpack.c.bf16 %v1059_v38, %v1058_v36  ;;  %3751 = vmatprep.subr.bf16.mxu1 %v3750_v37 }
 0x35c   :  { %v754_v46 = vadd.f32 %v742_v41, %v741_v44  ;;  %v3469_v47 = vpop.f32.mrb[18].mxu0  ;;  %3481 = vmatprep.mubr.msk.f32.mxu1 %vm92_vm0, %v753_v43  ;;  %v1061_v41 = vld [vmem:[%s4672_s11 + $0x28] sm:$0xff]  ;;  %3753 = vmatpush3.bf16.msra.mxu1 %v3750_v37 }
 0x35d   :  { %v708_v48 = vpop.f32.mrb[19].mxu0  ;;  %v744_v50 = vmul.f32 %v3469_v47, %v724_v14  ;;  %3755 = vmatprep.subr.bf16.mxu1 %v3754_v39  ;;  %v3758_v42 = vpack.c.bf16 %v1061_v41, %v1060_v40 }
 0x35e   :  { %v743_v49 = vmul.f32 %v722_v10, %v708_v48 }
 0x360   :  { %v755_v51 = vadd.f32 %v754_v46, %v743_v49  ;;  %3757 = vmatpush3.bf16.msra.mxu1 %v3754_v39 }
 0x361   :  { %3759 = vmatprep.subr.bf16.mxu1 %v3758_v42 }
 0x362   :  { %v756_v52 = vadd.f32 %v755_v51, %v744_v50  ;;  %v3109_v51 = vld [vmem:[%s4668_s7] ss:$0 sm:$0xff] }
 0x364   :  { %3482 = vmatmul.mubr.msk.f32.gmra.mrb[18].mxu1 %vm92_vm0, %v756_v52 }
 0x365   :  { %3761 = vmatpush3.bf16.msra.mxu1 %v3758_v42 }
 0x427   :  { %v3480_v54 = vpop.f32.mrb[16].mxu1 }
 0x428   :  { %v852_v55 = vadd.f32 %v3480_v54, %v3104_v53  ;;  %v846_v56 = vpop.f32.mrb[17].mxu1 }
 0x429   :  { %v847_v57 = vadd.f32 %v3104_v53, %v846_v56 }
 0x42a   :  { %v868_v58 = vadd.f32 %v852_v55, %v4135_v7 }
 0x42b   :  { %v867_v59 = vadd.f32 %v847_v57, %v4128_v5  ;;  %v3110_v57 = vld [vmem:[%s4669_s8] ss:$0 sm:$0xff] }
 0x42c   :  { %v874_v60 = vsel %vm92_vm0, %v868_v58, 0.0 }
 0x42d   :  { %875 = vadd.xlane.f32.xlu1 %v874_v60  ;;  %v871_v61 = vsel %vm92_vm0, %v867_v59, 0.0 }
 0x42e   :  { %872 = vadd.xlane.f32.xlu0 %v871_v61 }
 0x437   :  { %v3483_v62 = vpop.f32.mrb[18].mxu1 }
 0x438   :  { %v856_v63 = vpop.f32.mrb[19].mxu1  ;;  %v862_v0 = vadd.f32 %v3483_v62, %v3104_v53 }
 0x439   :  { %v857_v1 = vadd.f32 %v3104_v53, %v856_v63 }
 0x43a   :  { %v870_v4 = vadd.f32 %v862_v0, %v4149_v9 }
 0x43b   :  { %v869_v2 = vadd.f32 %v857_v1, %v4140_v8 }
 0x43c   :  { %v880_v7 = vsel %vm92_vm0, %v870_v4, 0.0 }
 0x43d   :  { %v877_v3 = vsel %vm92_vm0, %v869_v2, 0.0 }
 0x43e   :  { %878 = vadd.xlane.f32.xlu0 %v877_v3 }
 0x442   :  { %881 = vadd.xlane.f32.xlu0 %v880_v7 }
 0x4ba   :  { %v876_v5 = vpop.xlane.xlu1 %875 }
 0x4bb   :  { %v885_v6 = vmul.f32 0.03125, %v876_v5  ;;  %v873_v10 = vpop.xlane.xlu0 %872 }
 0x4bc   :  { %v884_v11 = vmul.f32 0.03125, %v873_v10 }
 0x4bd   :  { %v889_v13 = vsub.f32 %v868_v58, %v885_v6 }
 0x4be   :  { %v888_v14 = vsub.f32 %v867_v59, %v884_v11 }
 0x4bf   :  { %v893_v16 = vmul.f32 %v889_v13, %v889_v13 }
 0x4c0   :  { %v892_v17 = vmul.f32 %v888_v14, %v888_v14 }
 0x4c1   :  { %v899_v18 = vsel %vm92_vm0, %v893_v16, 0.0 }
 0x4c2   :  { %900 = vadd.xlane.f32.xlu0 %v899_v18  ;;  %v896_v8 = vsel %vm92_vm0, %v892_v17, 0.0  ;;  %v3111_v17 = vld [vmem:[%s4671_s10] ss:$0 sm:$0xff] }
 0x4c3   :  { %897 = vadd.xlane.f32.xlu1 %v896_v8 }
 0x4cb   :  { %v879_v19 = vpop.xlane.xlu0 %878 }
 0x4cc   :  { %v886_v9 = vmul.f32 0.03125, %v879_v19 }
 0x4ce   :  { %v4252_v20 = vsub.f32 %v869_v2, %v886_v9 }
 0x4cf   :  { %v882_v21 = vpop.xlane.xlu0 %881 }
 0x4d0   :  { %v887_v22 = vmul.f32 0.03125, %v882_v21  ;;  %v894_v23 = vmul.f32 %v4252_v20, %v4252_v20 }
 0x4d2   :  { %v4256_v24 = vsub.f32 %v870_v4, %v887_v22  ;;  %v902_v25 = vsel %vm92_vm0, %v894_v23, 0.0 }
 0x4d3   :  { %903 = vadd.xlane.f32.xlu1 %v902_v25 }
 0x4d4   :  { %v895_v26 = vmul.f32 %v4256_v24, %v4256_v24 }
 0x4d6   :  { %v905_v27 = vsel %vm92_vm0, %v895_v26, 0.0 }
 0x4d7   :  { %906 = vadd.xlane.f32.xlu0 %v905_v27 }
 0x54f   :  { %v901_v43 = vpop.xlane.xlu0 %900 }
 0x550   :  { %v909_v44 = vmul.f32 0.03125, %v901_v43  ;;  %v898_v46 = vpop.xlane.xlu1 %897 }
 0x551   :  { %v908_v47 = vmul.f32 0.03125, %v898_v46 }
 0x552   :  { %v913_v48 = vadd.f32 1e-05, %v909_v44 }
 0x553   :  { %v912_v49 = vadd.f32 1e-05, %v908_v47 }
 0x554   :  { %3896 = vrsqrt.f32 %v913_v48 }
 0x555   :  { %3898 = vrsqrt.f32 %v912_v49 }
 0x55e   :  { %v3897_v50 = vpop.eup %3896 }
 0x55f   :  { %v3899_v52 = vpop.eup %3898  ;;  %v921_v53 = vmul.f32 %v3897_v50, %v889_v13  ;;  %v1062_v13 = vld [vmem:[%s4672_s11 + $0x30] sm:$0xff] }
 0x560   :  { %v904_v54 = vpop.xlane.xlu1 %903  ;;  %v920_v55 = vmul.f32 %v3899_v52, %v888_v14  ;;  %v1063_v14 = vld [vmem:[%s4672_s11 + $0x38] sm:$0xff] }
 0x561   :  { %v910_v56 = vmul.f32 0.03125, %v904_v54  ;;  %v931_v58 = vmul.f32 %v3109_v51, %v921_v53  ;;  %v3762_v16 = vpack.c.bf16 %v1063_v14, %v1062_v13 }
 0x562   :  { %v930_v59 = vmul.f32 %v3109_v51, %v920_v55 }
 0x563   :  { %v914_v60 = vadd.f32 1e-05, %v910_v56  ;;  %v941_v0 = vadd.f32 %v3110_v57, %v931_v58  ;;  %3763 = vmatprep.subr.bf16.mxu1 %v3762_v16 }
 0x564   :  { %v907_v61 = vpop.xlane.xlu0 %906  ;;  %v940_v62 = vadd.f32 %v3110_v57, %v930_v59  ;;  %3765 = vmatpush3.bf16.msra.mxu1 %v3762_v16 }
 0x565   :  { %3900 = vrsqrt.f32 %v914_v60  ;;  %v911_v63 = vmul.f32 0.03125, %v907_v61  ;;  %3566 = vmatprep.subr.mxu1 %v4203_v45 }
 0x566   :  { %3492 = vmatprep.mubr.msk.f32.mxu0 %vm92_vm0, %v940_v62 }
 0x567   :  { %v915_v1 = vadd.f32 1e-05, %v911_v63  ;;  %3493 = vmatmul.mubr.msk.f32.vlgmr.msra.gmra.mrb[20].mxu0 %vm92_vm0, %v941_v0 }
 0x569   :  { %3902 = vrsqrt.f32 %v915_v1  ;;  %v3123_v1 = vld [vmem:[%s4699_s29 + $0x20] sm:$0xff] }
 0x56f   :  { %v3901_v2 = vpop.eup %3900 }
 0x570   :  { %v922_v3 = vmul.f32 %v3901_v2, %v4252_v20  ;;  %v3124_v2 = vld [vmem:[%s4699_s29 + $0x28] sm:$0xff] }
 0x572   :  { %v932_v4 = vmul.f32 %v3109_v51, %v922_v3  ;;  %v3766_v3 = vpack.c.bf16 %v3124_v2, %v3123_v1  ;;  %v3165_v2 = vld [vmem:[%s4704_s24 + $0x20] sm:$0xff] }
 0x573   :  { %v3903_v7 = vpop.eup %3902 }
 0x574   :  { %v942_v5 = vadd.f32 %v3110_v57, %v932_v4  ;;  %v923_v6 = vmul.f32 %v3903_v7, %v4256_v24  ;;  %3767 = vmatprep.subr.bf16.mxu0 %v3766_v3  ;;  %v3125_v4 = vld [vmem:[%s4699_s29 + $0x30] sm:$0xff]  ;;  %v3126_v7 = vld [vmem:[%s4699_s29 + $0x38] sm:$0xff] }
 0x575   :  { %3769 = vmatpush3.bf16.msra.mxu0 %v3766_v3  ;;  %v3166_v3 = vld [vmem:[%s4704_s24 + $0x28] sm:$0xff] }
 0x576   :  { %3495 = vmatprep.mubr.msk.f32.mxu0 %vm92_vm0, %v942_v5  ;;  %v933_v10 = vmul.f32 %v3109_v51, %v923_v6 }
 0x578   :  { %v943_v11 = vadd.f32 %v3110_v57, %v933_v10 }
 0x57a   :  { %3496 = vmatmul.mubr.msk.f32.gmra.mrb[22].mxu0 %vm92_vm0, %v943_v11 }
 0x63a   :  { %v3494_v18 = vpop.f32.mrb[20].mxu0 }
 0x63b   :  { %v1039_v8 = vadd.f32 %v3494_v18, %v3111_v17  ;;  %v1033_v19 = vpop.f32.mrb[21].mxu0  ;;  %v3121_v18 = vld [vmem:[%s4674_s13] ss:$0 sm:$0xff] }
 0x63c   :  { %v1034_v9 = vadd.f32 %v3111_v17, %v1033_v19 }
 0x63d   :  { %v1053_v21 = vmax.f32 %v1039_v8, 0.0 }
 0x63e   :  { %v1052_v20 = vmax.f32 %v1034_v9, 0.0 }
 0x640   :  { %3514 = vmatprep.mubr.msk.f32.mxu1 %vm1071_vm2, %v1052_v20  ;;  %v3122_v20 = vld [vmem:[%s4675_s14] ss:$0 sm:$0xff] }
 0x641   :  { %3515 = vmatmul.mubr.msk.f32.vlgmr.msra.gmra.mrb[20].mxu1 %vm1071_vm2, %v1053_v21 }
 0x642   :  { %3567 = vmatpush3.msra.mxu1 %v4203_v45 }
 0x64d   :  { %v3497_v22 = vpop.f32.mrb[22].mxu0 }
 0x64e   :  { %v1049_v23 = vadd.f32 %v3497_v22, %v3111_v17  ;;  %v1043_v24 = vpop.f32.mrb[23].mxu0 }
 0x64f   :  { %v1044_v25 = vadd.f32 %v3111_v17, %v1043_v24 }
 0x650   :  { %v1055_v27 = vmax.f32 %v1049_v23, 0.0 }
 0x651   :  { %v1054_v26 = vmax.f32 %v1044_v25, 0.0 }
 0x653   :  { %3517 = vmatprep.mubr.msk.f32.mxu1 %vm1071_vm2, %v1054_v26 }
 0x654   :  { %3518 = vmatmul.mubr.msk.f32.gmra.mrb[22].mxu1 %vm1071_vm2, %v1055_v27 }
 0x714   :  { %v3516_v29 = vpop.f32.mrb[20].mxu1 }
 0x715   :  { %v1156_v30 = vadd.f32 %v3516_v29, %v3116_v28  ;;  %v1150_v31 = vpop.f32.mrb[21].mxu1 }
 0x716   :  { %v1151_v32 = vadd.f32 %v3116_v28, %v1150_v31 }
 0x717   :  { %v1172_v33 = vadd.f32 %v1156_v30, %v941_v0 }
 0x718   :  { %v1171_v45 = vadd.f32 %v1151_v32, %v940_v62 }
 0x719   :  { %v1178_v34 = vsel %vm92_vm0, %v1172_v33, 0.0 }
 0x71a   :  { %1179 = vadd.xlane.f32.xlu0 %v1178_v34  ;;  %v1175_v35 = vsel %vm92_vm0, %v1171_v45, 0.0 }
 0x71b   :  { %1176 = vadd.xlane.f32.xlu1 %v1175_v35 }
 0x727   :  { %v3519_v36 = vpop.f32.mrb[22].mxu1 }
 0x728   :  { %v1166_v37 = vadd.f32 %v3519_v36, %v3116_v28  ;;  %v1160_v38 = vpop.f32.mrb[23].mxu1 }
 0x729   :  { %v1161_v39 = vadd.f32 %v3116_v28, %v1160_v38 }
 0x72a   :  { %v1174_v40 = vadd.f32 %v1166_v37, %v943_v11 }
 0x72b   :  { %v1173_v41 = vadd.f32 %v1161_v39, %v942_v5  ;;  %v3770_v5 = vpack.c.bf16 %v3126_v7, %v3125_v4  ;;  %v3782_v4 = vpack.c.bf16 %v3166_v3, %v3165_v2 }
 0x72c   :  { %v1184_v42 = vsel %vm92_vm0, %v1174_v40, 0.0 }
 0x72d   :  { %1185 = vadd.xlane.f32.xlu0 %v1184_v42  ;;  %v1181_v43 = vsel %vm92_vm0, %v1173_v41, 0.0  ;;  %3771 = vmatprep.subr.bf16.mxu0 %v3770_v5 }
 0x72e   :  { %1182 = vadd.xlane.f32.xlu1 %v1181_v43  ;;  %3773 = vmatpush3.bf16.msra.mxu0 %v3770_v5 }
 0x72f   :  { %3775 = vmatprep.subr.bf16.mxu0 %v4159_v12 }
 0x7a7   :  { %v1180_v44 = vpop.xlane.xlu0 %1179 }
 0x7a8   :  { %v1188_v46 = vmul.f32 0.03125, %v1180_v44  ;;  %v1177_v47 = vpop.xlane.xlu1 %1176 }
 0x7a9   :  { %v1187_v48 = vmul.f32 0.03125, %v1177_v47 }
 0x7aa   :  { %v1192_v49 = vsub.f32 %v1172_v33, %v1188_v46 }
 0x7ab   :  { %v1191_v50 = vsub.f32 %v1171_v45, %v1187_v48 }
 0x7ac   :  { %v1196_v51 = vmul.f32 %v1192_v49, %v1192_v49 }
 0x7ad   :  { %v1195_v52 = vmul.f32 %v1191_v50, %v1191_v50 }
 0x7ae   :  { %v1202_v53 = vsel %vm92_vm0, %v1196_v51, 0.0 }
 0x7af   :  { %1203 = vadd.xlane.f32.xlu0 %v1202_v53  ;;  %v1199_v54 = vsel %vm92_vm0, %v1195_v52, 0.0 }
 0x7b0   :  { %1200 = vadd.xlane.f32.xlu1 %v1199_v54 }
 0x7ba   :  { %v1186_v55 = vpop.xlane.xlu0 %1185 }
 0x7bb   :  { %v1190_v56 = vmul.f32 0.03125, %v1186_v55  ;;  %v1183_v57 = vpop.xlane.xlu1 %1182 }
 0x7bc   :  { %v1189_v58 = vmul.f32 0.03125, %v1183_v57 }
 0x7bd   :  { %v1194_v59 = vsub.f32 %v1174_v40, %v1190_v56 }
 0x7be   :  { %v1193_v60 = vsub.f32 %v1173_v41, %v1189_v58 }
 0x7bf   :  { %v1198_v61 = vmul.f32 %v1194_v59, %v1194_v59 }
 0x7c0   :  { %v1197_v62 = vmul.f32 %v1193_v60, %v1193_v60 }
 0x7c1   :  { %v1208_v63 = vsel %vm92_vm0, %v1198_v61, 0.0 }
 0x7c2   :  { %1209 = vadd.xlane.f32.xlu0 %v1208_v63  ;;  %v1205_v0 = vsel %vm92_vm0, %v1197_v62, 0.0 }
 0x7c3   :  { %1206 = vadd.xlane.f32.xlu1 %v1205_v0 }
 0x83c   :  { %v1204_v6 = vpop.xlane.xlu0 %1203 }
 0x83d   :  { %v1212_v10 = vmul.f32 0.03125, %v1204_v6  ;;  %v1201_v11 = vpop.xlane.xlu1 %1200 }
 0x83e   :  { %v1211_v13 = vmul.f32 0.03125, %v1201_v11 }
 0x83f   :  { %v1216_v14 = vadd.f32 1e-05, %v1212_v10 }
 0x840   :  { %v1215_v16 = vadd.f32 1e-05, %v1211_v13 }
 0x841   :  { %3904 = vrsqrt.f32 %v1216_v14 }
 0x842   :  { %3906 = vrsqrt.f32 %v1215_v16 }
 0x84b   :  { %v3905_v17 = vpop.eup %3904 }
 0x84c   :  { %v3907_v8 = vpop.eup %3906  ;;  %v1224_v19 = vmul.f32 %v3905_v17, %v1192_v49 }
 0x84d   :  { %v1223_v9 = vmul.f32 %v3907_v8, %v1191_v50 }
 0x84e   :  { %v1234_v21 = vmul.f32 %v3121_v18, %v1224_v19 }
 0x84f   :  { %v1210_v22 = vpop.xlane.xlu0 %1209  ;;  %v1233_v23 = vmul.f32 %v3121_v18, %v1223_v9 }
 0x850   :  { %v1214_v24 = vmul.f32 0.03125, %v1210_v22  ;;  %v1207_v25 = vpop.xlane.xlu1 %1206  ;;  %v4351_v29 = vadd.f32 %v3122_v20, %v1234_v21 }
 0x851   :  { %v1213_v26 = vmul.f32 0.03125, %v1207_v25  ;;  %v4349_v27 = vadd.f32 %v3122_v20, %v1233_v23 }
 0x852   :  { %v1218_v28 = vadd.f32 1e-05, %v1214_v24 }
 0x853   :  { %v1217_v30 = vadd.f32 1e-05, %v1213_v26  ;;  %3528 = vmatprep.mubr.msk.f32.mxu0 %vm92_vm0, %v4349_v27 }
 0x854   :  { %3908 = vrsqrt.f32 %v1218_v28  ;;  %3529 = vmatmul.mubr.msk.f32.vlgmr.msra.gmra.mrb[24].mxu0 %vm92_vm0, %v4351_v29 }
 0x855   :  { %3910 = vrsqrt.f32 %v1217_v30  ;;  %3777 = vmatpush3.bf16.msra.mxu0 %v4159_v12  ;;  %v3128_v12 = vld [vmem:[%s4702_s3 + $0x1] ss:$0 sm:$0xff] }
 0x856   :  { %3779 = vmatprep.subr.bf16.mxu0 %v4169_v15 }
 0x859   :  { %3781 = vmatpush3.bf16.msra.mxu0 %v4169_v15 }
 0x85a   :  { %3783 = vmatprep.subr.bf16.mxu0 %v3782_v4 }
 0x85e   :  { %v3909_v31 = vpop.eup %3908 }
 0x85f   :  { %v3911_v32 = vpop.eup %3910  ;;  %v1226_v33 = vmul.f32 %v3909_v31, %v1194_v59 }
 0x860   :  { %v1225_v45 = vmul.f32 %v3911_v32, %v1193_v60 }
 0x861   :  { %v1236_v34 = vmul.f32 %v3121_v18, %v1226_v33 }
 0x862   :  { %v1235_v35 = vmul.f32 %v3121_v18, %v1225_v45 }
 0x863   :  { %v4362_v37 = vadd.f32 %v3122_v20, %v1236_v34 }
 0x864   :  { %v4360_v36 = vadd.f32 %v3122_v20, %v1235_v35 }
 0x866   :  { %3531 = vmatprep.mubr.msk.f32.mxu0 %vm92_vm0, %v4360_v36 }
 0x867   :  { %3532 = vmatmul.mubr.msk.f32.gmra.mrb[26].mxu0 %vm92_vm0, %v4362_v37 }
 0x927   :  { %v3530_v15 = vpop.f32.mrb[24].mxu0 }
 0x928   :  { %v1344_v38 = vadd.f32 %v3530_v15, %v3128_v12  ;;  %v1338_v39 = vpop.f32.mrb[25].mxu0 }
 0x929   :  { %v1339_v40 = vadd.f32 %v3128_v12, %v1338_v39 }
 0x92a   :  { %1363 = vrot.lane.b32.xlu0 %v1344_v38, %s3992_s28 }
 0x92b   :  { %1361 = vrot.lane.b32.xlu1 %v1339_v40, %s3992_s28 }
 0x92e   :  { %1883 = vrot.lane.b32.xlu0 %v1339_v40, %s4706_s27 }
 0x93a   :  { %v3533_v41 = vpop.f32.mrb[26].mxu0 }
 0x93b   :  { %v1348_v42 = vpop.f32.mrb[27].mxu0  ;;  %v1354_v44 = vadd.f32 %v3533_v41, %v3128_v12 }
 0x93c   :  { %v1349_v43 = vadd.f32 %v3128_v12, %v1348_v42 }
 0x93e   :  { %1887 = vrot.lane.b32.xlu0 %v1349_v43, %s4706_s27  ;;  %1365 = vrot.lane.b32.xlu1 %v1349_v43, %s3992_s28 }
 0x942   :  { %1367 = vrot.lane.b32.xlu1 %v1354_v44, %s3992_s28 }
 0x946   :  { %1885 = vrot.lane.b32.xlu1 %v1344_v38, %s4706_s27 }
 0x94a   :  { %1889 = vrot.lane.b32.xlu1 %v1354_v44, %s4706_s27 }
 0x99c   :  { %v1364_v46 = vpop.permute.xlu0 %1363 }
 0x99d   :  { %v1362_v47 = vpop.permute.xlu1 %1361  ;;  %v1374_v49 = vmul.f32 %v1364_v46, %v1339_v40  ;;  %v1378_v55 = vmul.f32 %v1364_v46, %v1344_v38  ;;  %v1382_v59 = vmul.f32 %v1364_v46, %v1349_v43  ;;  %v1386_v63 = vmul.f32 %v1364_v46, %v1354_v44 }
 0x99e   :  { %v1373_v48 = vmul.f32 %v1362_v47, %v1339_v40  ;;  %v1377_v54 = vmul.f32 %v1362_v47, %v1344_v38  ;;  %v1381_v58 = vmul.f32 %v1362_v47, %v1349_v43  ;;  %v1385_v62 = vmul.f32 %v1362_v47, %v1354_v44 }
 0x9a0   :  { %3542 = vmatprep.mubr.msk.f32.mxu0 %vm92_vm0, %v1373_v48 }
 0x9a1   :  { %3543 = vmatmul.mubr.msk.f32.vlgmr.msra.gmra.mrb[28].mxu0 %vm92_vm0, %v1374_v49 }
 0x9a2   :  { %3785 = vmatpush3.bf16.msra.mxu0 %v3782_v4 }
 0x9b0   :  { %v1366_v50 = vpop.permute.xlu1 %1365 }
 0x9b1   :  { %v1375_v51 = vmul.f32 %v1366_v50, %v1339_v40  ;;  %v1379_v56 = vmul.f32 %v1366_v50, %v1344_v38  ;;  %v1383_v60 = vmul.f32 %v1366_v50, %v1349_v43  ;;  %v1387_v0 = vmul.f32 %v1366_v50, %v1354_v44 }
 0x9b3   :  { %3545 = vmatprep.mubr.msk.f32.mxu0 %vm92_vm0, %v1375_v51 }
 0x9b4   :  { %v1368_v52 = vpop.permute.xlu1 %1367 }
 0x9b5   :  { %v1376_v53 = vmul.f32 %v1368_v52, %v1339_v40  ;;  %v1380_v57 = vmul.f32 %v1368_v52, %v1344_v38  ;;  %v1384_v61 = vmul.f32 %v1368_v52, %v1349_v43  ;;  %v1388_v1 = vmul.f32 %v1368_v52, %v1354_v44 }
 0x9b7   :  { %3546 = vmatmul.mubr.msk.f32.gmra.mrb[30].mxu0 %vm92_vm0, %v1376_v53 }
 0x9b8   :  { %3548 = vmatprep.mubr.msk.f32.mxu0 %vm92_vm0, %v1377_v54 }
 0x9bb   :  { %3549 = vmatmul.mubr.msk.f32.gmra.mrb[32].mxu0 %vm92_vm0, %v1378_v55 }
 0x9bc   :  { %3551 = vmatprep.mubr.msk.f32.mxu0 %vm92_vm0, %v1379_v56 }
 0x9bf   :  { %3552 = vmatmul.mubr.msk.f32.gmra.mrb[34].mxu0 %vm92_vm0, %v1380_v57 }
 0x9c0   :  { %3554 = vmatprep.mubr.msk.f32.mxu0 %vm92_vm0, %v1381_v58 }
 0x9c3   :  { %3555 = vmatmul.mubr.msk.f32.gmra.mrb[36].mxu0 %vm92_vm0, %v1382_v59 }
 0x9c4   :  { %3557 = vmatprep.mubr.msk.f32.mxu0 %vm92_vm0, %v1383_v60 }
 0x9c7   :  { %3558 = vmatmul.mubr.msk.f32.gmra.mrb[38].mxu0 %vm92_vm0, %v1384_v61 }
 0x9c8   :  { %3560 = vmatprep.mubr.msk.f32.mxu0 %vm92_vm0, %v1385_v62 }
 0x9cb   :  { %3561 = vmatmul.mubr.msk.f32.gmra.mrb[40].mxu0 %vm92_vm0, %v1386_v63 }
 0x9cc   :  { %3563 = vmatprep.mubr.msk.f32.mxu0 %vm92_vm0, %v1387_v0 }
 0x9cf   :  { %3564 = vmatmul.mubr.msk.f32.gmra.mrb[42].mxu0 %vm92_vm0, %v1388_v1 }
 0xa74   :  { %v3544_v7 = vpop.f32.mrb[28].mxu0 }
 0xa75   :  { %v1583_v5 = vmul.f32 0.5, %v3544_v7  ;;  %v1503_v6 = vpop.f32.mrb[29].mxu0 }
 0xa76   :  { %v1582_v10 = vmul.f32 0.5, %v1503_v6 }
 0xa78   :  { %v1598_v11 = vmax.f32 %v1582_v10, %v1583_v5 }
 0xa8a   :  { %v3547_v13 = vpop.f32.mrb[30].mxu0 }
 0xa8b   :  { %v1513_v14 = vpop.f32.mrb[31].mxu0  ;;  %v1585_v17 = vmul.f32 0.5, %v3547_v13 }
 0xa8c   :  { %v1584_v16 = vmul.f32 0.5, %v1513_v14 }
 0xa8e   :  { %v1599_v18 = vmax.f32 %v1598_v11, %v1584_v16  ;;  %v3550_v8 = vpop.f32.mrb[32].mxu0 }
 0xa8f   :  { %v1587_v19 = vmul.f32 0.5, %v3550_v8  ;;  %v1523_v9 = vpop.f32.mrb[33].mxu0 }
 0xa90   :  { %v1600_v20 = vmax.f32 %v1599_v18, %v1585_v17  ;;  %v1586_v21 = vmul.f32 0.5, %v1523_v9 }
 0xa92   :  { %v1601_v22 = vsub.f32 %v1582_v10, %v1600_v20  ;;  %v1604_v23 = vsub.f32 %v1583_v5, %v1600_v20  ;;  %v1607_v24 = vsub.f32 %v1584_v16, %v1600_v20  ;;  %v1610_v25 = vsub.f32 %v1585_v17, %v1600_v20  ;;  %v3553_v26 = vpop.f32.mrb[34].mxu0 }
 0xa93   :  { %v1621_v28 = vmax.f32 %v1586_v21, %v1587_v19  ;;  %v1533_v30 = vpop.f32.mrb[35].mxu0  ;;  %v1589_v12 = vmul.f32 0.5, %v3553_v26 }
 0xa94   :  { %v1602_v31 = vmul.f32 1.442695, %v1601_v22  ;;  %v1605_v32 = vmul.f32 1.442695, %v1604_v23  ;;  %v1608_v33 = vmul.f32 1.442695, %v1607_v24 }
 0xa95   :  { %v1588_v45 = vmul.f32 0.5, %v1533_v30  ;;  %v1611_v34 = vmul.f32 1.442695, %v1610_v25 }
 0xa96   :  { %3912 = vpow2.f32 %v1602_v31  ;;  %v3556_v35 = vpop.f32.mrb[36].mxu0 }
 0xa97   :  { %3914 = vpow2.f32 %v1605_v32  ;;  %v1622_v15 = vmax.f32 %v1621_v28, %v1588_v45  ;;  %v1591_v38 = vmul.f32 0.5, %v3556_v35  ;;  %v1543_v39 = vpop.f32.mrb[37].mxu0 }
 0xa98   :  { %v1590_v40 = vmul.f32 0.5, %v1543_v39  ;;  %3916 = vpow2.f32 %v1608_v33 }
 0xa99   :  { %v1623_v41 = vmax.f32 %v1622_v15, %v1589_v12  ;;  %3918 = vpow2.f32 %v1611_v34 }
 0xa9a   :  { %v1644_v42 = vmax.f32 %v1590_v40, %v1591_v38  ;;  %v3559_v43 = vpop.f32.mrb[38].mxu0 }
 0xa9b   :  { %v1624_v44 = vsub.f32 %v1586_v21, %v1623_v41  ;;  %v1627_v46 = vsub.f32 %v1587_v19, %v1623_v41  ;;  %v1630_v47 = vsub.f32 %v1588_v45, %v1623_v41  ;;  %v1633_v48 = vsub.f32 %v1589_v12, %v1623_v41  ;;  %v1553_v49 = vpop.f32.mrb[39].mxu0 }
 0xa9c   :  { %v1592_v50 = vmul.f32 0.5, %v1553_v49  ;;  %v1593_v54 = vmul.f32 0.5, %v3559_v43 }
 0xa9d   :  { %v1625_v51 = vmul.f32 1.442695, %v1624_v44  ;;  %v1628_v52 = vmul.f32 1.442695, %v1627_v46  ;;  %v1631_v53 = vmul.f32 1.442695, %v1630_v47 }
 0xa9e   :  { %v1645_v55 = vmax.f32 %v1644_v42, %v1592_v50  ;;  %v3562_v56 = vpop.f32.mrb[40].mxu0  ;;  %v1634_v57 = vmul.f32 1.442695, %v1633_v48 }
 0xa9f   :  { %3920 = vpow2.f32 %v1625_v51  ;;  %v1595_v58 = vmul.f32 0.5, %v3562_v56  ;;  %v1563_v59 = vpop.f32.mrb[41].mxu0 }
 0xaa0   :  { %v3913_v60 = vpop.eup %3912  ;;  %3922 = vpow2.f32 %v1628_v52  ;;  %v1646_v61 = vmax.f32 %v1645_v55, %v1593_v54  ;;  %v1594_v62 = vmul.f32 0.5, %v1563_v59 }
 0xaa1   :  { %v3915_v63 = vpop.eup %3914  ;;  %3924 = vpow2.f32 %v1631_v53 }
 0xaa2   :  { %v1613_v0 = vadd.f32 %v3915_v63, %v3913_v60  ;;  %v1647_v1 = vsub.f32 %v1590_v40, %v1646_v61  ;;  %v1650_v2 = vsub.f32 %v1591_v38, %v1646_v61  ;;  %v3565_v3 = vpop.f32.mrb[42].mxu0  ;;  %v3917_v4 = vpop.eup %3916  ;;  %3926 = vpow2.f32 %v1634_v57 }
 0xaa3   :  { %v1653_v7 = vsub.f32 %v1592_v50, %v1646_v61  ;;  %v1656_v5 = vsub.f32 %v1593_v54, %v1646_v61  ;;  %v1667_v6 = vmax.f32 %v1594_v62, %v1595_v58  ;;  %v1573_v10 = vpop.f32.mrb[43].mxu0  ;;  %v3919_v11 = vpop.eup %3918  ;;  %v1597_v19 = vmul.f32 0.5, %v3565_v3 }
 0xaa4   :  { %v1614_v13 = vadd.f32 %v3917_v4, %v1613_v0  ;;  %v1648_v14 = vmul.f32 1.442695, %v1647_v1  ;;  %v1651_v16 = vmul.f32 1.442695, %v1650_v2  ;;  %v1596_v17 = vmul.f32 0.5, %v1573_v10 }
 0xaa5   :  { %v1654_v18 = vmul.f32 1.442695, %v1653_v7  ;;  %v1657_v20 = vmul.f32 1.442695, %v1656_v5 }
 0xaa6   :  { %v1615_v8 = vadd.f32 %v3919_v11, %v1614_v13  ;;  %3928 = vpow2.f32 %v1648_v14  ;;  %v1668_v9 = vmax.f32 %v1667_v6, %v1596_v17  ;;  %v3168_v13 = vld [vmem:[%s4704_s24 + $0x38] sm:$0xff] }
 0xaa7   :  { %3930 = vpow2.f32 %v1651_v16  ;;  %v1886_v16 = vpop.permute.xlu1 %1885 }
 0xaa8   :  { %3932 = vrcp.f32 %v1615_v8  ;;  %v1669_v21 = vmax.f32 %v1668_v9, %v1597_v19 }
 0xaa9   :  { %v3921_v22 = vpop.eup %3920  ;;  %3934 = vpow2.f32 %v1654_v18  ;;  %v1884_v18 = vpop.permute.xlu0 %1883 }
 0xaaa   :  { %v3923_v23 = vpop.eup %3922  ;;  %v1670_v24 = vsub.f32 %v1594_v62, %v1669_v21  ;;  %v1673_v25 = vsub.f32 %v1595_v58, %v1669_v21  ;;  %v1676_v26 = vsub.f32 %v1596_v17, %v1669_v21  ;;  %3936 = vpow2.f32 %v1657_v20 }
 0xaab   :  { %v1636_v28 = vadd.f32 %v3923_v23, %v3921_v22  ;;  %v1679_v30 = vsub.f32 %v1597_v19, %v1669_v21  ;;  %v3925_v31 = vpop.eup %3924 }
 0xaac   :  { %v1671_v32 = vmul.f32 1.442695, %v1670_v24  ;;  %v1674_v33 = vmul.f32 1.442695, %v1673_v25  ;;  %v1677_v45 = vmul.f32 1.442695, %v1676_v26  ;;  %v3927_v34 = vpop.eup %3926  ;;  %v1890_v25 = vpop.permute.xlu1 %1889 }
 0xaad   :  { %v1637_v35 = vadd.f32 %v3925_v31, %v1636_v28  ;;  %v1680_v12 = vmul.f32 1.442695, %v1679_v30 }
 0xaae   :  { %3938 = vpow2.f32 %v1671_v32 }
 0xaaf   :  { %v1638_v15 = vadd.f32 %v3927_v34, %v1637_v35  ;;  %3940 = vpow2.f32 %v1674_v33 }
 0xab0   :  { %v3929_v38 = vpop.eup %3928  ;;  %3942 = vpow2.f32 %v1677_v45 }
 0xab1   :  { %v3931_v39 = vpop.eup %3930  ;;  %3944 = vrcp.f32 %v1638_v15 }
 0xab2   :  { %v3933_v40 = vpop.eup %3932  ;;  %v1659_v41 = vadd.f32 %v3931_v39, %v3929_v38  ;;  %3946 = vpow2.f32 %v1680_v12 }
 0xab3   :  { %v3935_v42 = vpop.eup %3934  ;;  %v1617_v43 = vmul.f32 %v3933_v40, %v3913_v60  ;;  %v1618_v44 = vmul.f32 %v3933_v40, %v3915_v63  ;;  %v1619_v46 = vmul.f32 %v3933_v40, %v3917_v4  ;;  %v1620_v47 = vmul.f32 %v3933_v40, %v3919_v11  ;;  %v3167_v11 = vld [vmem:[%s4704_s24 + $0x30] sm:$0xff] }
 0xab4   :  { %v1660_v48 = vadd.f32 %v3935_v42, %v1659_v41  ;;  %v3937_v49 = vpop.eup %3936  ;;  %v3786_v14 = vpack.c.bf16 %v3168_v13, %v3167_v11 }
 0xab5   :  { %3568 = vmatprep.mubr.msk.f32.mxu1 %vm523_vm1, %v1617_v43 }
 0xab6   :  { %v1661_v50 = vadd.f32 %v3937_v49, %v1660_v48  ;;  %3569 = vmatmul.mubr.msk.f32.vlgmr.msra.gmra.mrb[24].mxu1 %vm523_vm1, %v1618_v44  ;;  %3787 = vmatprep.subr.bf16.mxu0 %v3786_v14 }
 0xab7   :  { %3571 = vmatprep.mubr.msk.f32.mxu1 %vm523_vm1, %v1619_v46  ;;  %3789 = vmatpush3.bf16.msra.mxu0 %v3786_v14 }
 0xab8   :  { %v3939_v51 = vpop.eup %3938  ;;  %3948 = vrcp.f32 %v1661_v50 }
 0xab9   :  { %v3941_v52 = vpop.eup %3940 }
 0xaba   :  { %v3943_v53 = vpop.eup %3942  ;;  %v1682_v54 = vadd.f32 %v3941_v52, %v3939_v51  ;;  %3572 = vmatmul.mubr.msk.f32.gmra.mrb[26].mxu1 %vm523_vm1, %v1620_v47 }
 0xabb   :  { %v3945_v55 = vpop.eup %3944 }
 0xabc   :  { %v3947_v56 = vpop.eup %3946  ;;  %v1683_v57 = vadd.f32 %v3943_v53, %v1682_v54  ;;  %v1640_v58 = vmul.f32 %v3945_v55, %v3921_v22  ;;  %v1641_v59 = vmul.f32 %v3945_v55, %v3923_v23  ;;  %v1642_v60 = vmul.f32 %v3945_v55, %v3925_v31  ;;  %v1888_v22 = vpop.permute.xlu0 %1887 }
 0xabd   :  { %v1643_v61 = vmul.f32 %v3945_v55, %v3927_v34 }
 0xabe   :  { %v1684_v62 = vadd.f32 %v3947_v56, %v1683_v57  ;;  %3574 = vmatprep.mubr.msk.f32.mxu1 %vm523_vm1, %v1640_v58 }
 0xabf   :  { %3575 = vmatmul.mubr.msk.f32.gmra.mrb[28].mxu1 %vm523_vm1, %v1641_v59 }
 0xac0   :  { %3950 = vrcp.f32 %v1684_v62  ;;  %3577 = vmatprep.mubr.msk.f32.mxu1 %vm523_vm1, %v1642_v60 }
 0xac2   :  { %v3949_v63 = vpop.eup %3948 }
 0xac3   :  { %3578 = vmatmul.mubr.msk.f32.gmra.mrb[30].mxu1 %vm523_vm1, %v1643_v61  ;;  %v1663_v0 = vmul.f32 %v3949_v63, %v3929_v38  ;;  %v1664_v1 = vmul.f32 %v3949_v63, %v3931_v39  ;;  %v1665_v2 = vmul.f32 %v3949_v63, %v3935_v42  ;;  %v1666_v3 = vmul.f32 %v3949_v63, %v3937_v49 }
 0xac5   :  { %3580 = vmatprep.mubr.msk.f32.mxu1 %vm523_vm1, %v1663_v0  ;;  %v3170_v0 = vld [vmem:[%s4705_s1 + $0x1] ss:$0 sm:$0xff] }
 0xac7   :  { %3581 = vmatmul.mubr.msk.f32.gmra.mrb[32].mxu1 %vm523_vm1, %v1664_v1 }
 0xac8   :  { %3583 = vmatprep.mubr.msk.f32.mxu1 %vm523_vm1, %v1665_v2 }
 0xaca   :  { %v3951_v4 = vpop.eup %3950 }
 0xacb   :  { %3584 = vmatmul.mubr.msk.f32.gmra.mrb[34].mxu1 %vm523_vm1, %v1666_v3  ;;  %v1686_v7 = vmul.f32 %v3951_v4, %v3939_v51  ;;  %v1687_v5 = vmul.f32 %v3951_v4, %v3941_v52  ;;  %v1688_v6 = vmul.f32 %v3951_v4, %v3943_v53  ;;  %v1689_v10 = vmul.f32 %v3951_v4, %v3947_v56 }
 0xacd   :  { %3586 = vmatprep.mubr.msk.f32.mxu1 %vm523_vm1, %v1686_v7 }
 0xacf   :  { %3587 = vmatmul.mubr.msk.f32.gmra.mrb[36].mxu1 %vm523_vm1, %v1687_v5 }
 0xad0   :  { %3589 = vmatprep.mubr.msk.f32.mxu1 %vm523_vm1, %v1688_v6 }
 0xad3   :  { %3590 = vmatmul.mubr.msk.f32.gmra.mrb[38].mxu1 %vm523_vm1, %v1689_v10 }
 0xb89   :  { %v3570_v17 = vpop.f32.mrb[24].mxu1 }
 0xb8a   :  { %v1896_v8 = vmul.f32 %v3570_v17, %v1886_v16  ;;  %v1804_v19 = vpop.f32.mrb[25].mxu1 }
 0xb8b   :  { %v1895_v9 = vmul.f32 %v1884_v18, %v1804_v19 }
 0xb8d   :  { %v1911_v20 = vadd.f32 %v1896_v8, %v1895_v9  ;;  %v3573_v21 = vpop.f32.mrb[26].mxu1 }
 0xb8e   :  { %v1814_v23 = vpop.f32.mrb[27].mxu1  ;;  %v1898_v26 = vmul.f32 %v3573_v21, %v1890_v25 }
 0xb8f   :  { %v1897_v24 = vmul.f32 %v1888_v22, %v1814_v23 }
 0xb91   :  { %v1912_v28 = vadd.f32 %v1911_v20, %v1897_v24 }
 0xb92   :  { %v3576_v30 = vpop.f32.mrb[28].mxu1 }
 0xb93   :  { %v1913_v31 = vadd.f32 %v1912_v28, %v1898_v26  ;;  %v1900_v32 = vmul.f32 %v3576_v30, %v1886_v16  ;;  %v1824_v33 = vpop.f32.mrb[29].mxu1 }
 0xb94   :  { %v1899_v45 = vmul.f32 %v1884_v18, %v1824_v33 }
 0xb95   :  { %3600 = vmatprep.mubr.msk.f32.mxu0 %vm92_vm0, %v1913_v31 }
 0xb96   :  { %v1914_v34 = vadd.f32 %v1900_v32, %v1899_v45  ;;  %v3579_v35 = vpop.f32.mrb[30].mxu1 }
 0xb97   :  { %v1834_v12 = vpop.f32.mrb[31].mxu1  ;;  %v1902_v38 = vmul.f32 %v3579_v35, %v1890_v25 }
 0xb98   :  { %v1901_v15 = vmul.f32 %v1888_v22, %v1834_v12  ;;  %v3179_v12 = vld [vmem:[%s4670_s9 + $0x20] sm:$0xff] }
 0xb9a   :  { %v1915_v39 = vadd.f32 %v1914_v34, %v1901_v15  ;;  %v3582_v40 = vpop.f32.mrb[32].mxu1  ;;  %v3180_v15 = vld [vmem:[%s4670_s9 + $0x28] sm:$0xff] }
 0xb9b   :  { %v1904_v41 = vmul.f32 %v3582_v40, %v1886_v16  ;;  %v1844_v42 = vpop.f32.mrb[33].mxu1  ;;  %v3182_v40 = vld [vmem:[%s4670_s9 + $0x38] sm:$0xff] }
 0xb9c   :  { %v1916_v43 = vadd.f32 %v1915_v39, %v1902_v38  ;;  %v1903_v44 = vmul.f32 %v1884_v18, %v1844_v42  ;;  %v3790_v38 = vpack.c.bf16 %v3180_v15, %v3179_v12  ;;  %v3181_v39 = vld [vmem:[%s4670_s9 + $0x30] sm:$0xff]  ;;  %v3189_v42 = vld [vmem:[%s4672_s11 + $0x40] sm:$0xff] }
 0xb9e   :  { %v1917_v46 = vadd.f32 %v1904_v41, %v1903_v44  ;;  %v3585_v47 = vpop.f32.mrb[34].mxu1  ;;  %3601 = vmatmul.mubr.msk.f32.vlgmr.msra.gmra.mrb[44].mxu0 %vm92_vm0, %v1916_v43  ;;  %v3794_v41 = vpack.c.bf16 %v3182_v40, %v3181_v39  ;;  %3791 = vmatprep.subr.bf16.mxu1 %v3790_v38  ;;  %v3190_v43 = vld [vmem:[%s4672_s11 + $0x48] sm:$0xff]  ;;  %v3191_v44 = vld [vmem:[%s4672_s11 + $0x50] sm:$0xff] }
 0xb9f   :  { %v1854_v48 = vpop.f32.mrb[35].mxu1  ;;  %v1906_v50 = vmul.f32 %v3585_v47, %v1890_v25  ;;  %3793 = vmatpush3.bf16.msra.mxu1 %v3790_v38  ;;  %v3192_v47 = vld [vmem:[%s4672_s11 + $0x58] sm:$0xff] }
 0xba0   :  { %v1905_v49 = vmul.f32 %v1888_v22, %v1854_v48  ;;  %3795 = vmatprep.subr.bf16.mxu1 %v3794_v41  ;;  %v3802_v48 = vpack.c.bf16 %v3192_v47, %v3191_v44 }
 0xba2   :  { %v1918_v51 = vadd.f32 %v1917_v46, %v1905_v49  ;;  %v3588_v52 = vpop.f32.mrb[36].mxu1  ;;  %v3798_v46 = vpack.c.bf16 %v3190_v43, %v3189_v42  ;;  %v3193_v49 = vld [vmem:[%s4672_s11 + $0x60] sm:$0xff] }
 0xba3   :  { %v1908_v53 = vmul.f32 %v3588_v52, %v1886_v16  ;;  %v1864_v54 = vpop.f32.mrb[37].mxu1  ;;  %3797 = vmatpush3.bf16.msra.mxu1 %v3794_v41 }
 0xba4   :  { %v1919_v55 = vadd.f32 %v1918_v51, %v1906_v50  ;;  %v1907_v56 = vmul.f32 %v1884_v18, %v1864_v54  ;;  %v3194_v50 = vld [vmem:[%s4672_s11 + $0x68] sm:$0xff]  ;;  %3799 = vmatprep.subr.bf16.mxu0 %v3798_v46 }
 0xba5   :  { %3801 = vmatpush3.bf16.msra.mxu0 %v3798_v46  ;;  %v3806_v51 = vpack.c.bf16 %v3194_v50, %v3193_v49 }
 0xba6   :  { %v1920_v57 = vadd.f32 %v1908_v53, %v1907_v56  ;;  %v3591_v58 = vpop.f32.mrb[38].mxu1  ;;  %3603 = vmatprep.mubr.msk.f32.mxu0 %vm92_vm0, %v1919_v55  ;;  %3803 = vmatprep.subr.bf16.mxu0 %v3802_v48 }
 0xba7   :  { %v1874_v59 = vpop.f32.mrb[39].mxu1  ;;  %v1910_v61 = vmul.f32 %v3591_v58, %v1890_v25 }
 0xba8   :  { %v1909_v60 = vmul.f32 %v1888_v22, %v1874_v59  ;;  %v3177_v59 = vld [vmem:[%s4668_s7 + $0x1] ss:$0 sm:$0xff] }
 0xba9   :  { %3805 = vmatpush3.bf16.msra.mxu0 %v3802_v48 }
 0xbaa   :  { %v1921_v62 = vadd.f32 %v1920_v57, %v1909_v60  ;;  %3807 = vmatprep.subr.bf16.mxu0 %v3806_v51 }
 0xbac   :  { %v1922_v63 = vadd.f32 %v1921_v62, %v1910_v61 }
 0xbad   :  { %3809 = vmatpush3.bf16.msra.mxu0 %v3806_v51 }
 0xbae   :  { %3604 = vmatmul.mubr.msk.f32.gmra.mrb[46].mxu0 %vm92_vm0, %v1922_v63 }
 0xc71   :  { %v3602_v1 = vpop.f32.mrb[44].mxu0 }
 0xc72   :  { %v2020_v2 = vadd.f32 %v3602_v1, %v3170_v0  ;;  %v2014_v3 = vpop.f32.mrb[45].mxu0  ;;  %v3178_v1 = vld [vmem:[%s4669_s8 + $0x1] ss:$0 sm:$0xff] }
 0xc73   :  { %v2015_v4 = vadd.f32 %v3170_v0, %v2014_v3 }
 0xc74   :  { %v2038_v7 = vadd.f32 %v2020_v2, %v4351_v29 }
 0xc75   :  { %v2037_v5 = vadd.f32 %v2015_v4, %v4349_v27 }
 0xc76   :  { %v2044_v6 = vsel %vm92_vm0, %v2038_v7, 0.0 }
 0xc77   :  { %2045 = vadd.xlane.f32.xlu1 %v2044_v6  ;;  %v2041_v10 = vsel %vm92_vm0, %v2037_v5, 0.0 }
 0xc78   :  { %2042 = vadd.xlane.f32.xlu0 %v2041_v10 }
 0xc81   :  { %v3605_v11 = vpop.f32.mrb[46].mxu0 }
 0xc82   :  { %v2024_v13 = vpop.f32.mrb[47].mxu0  ;;  %v2030_v14 = vadd.f32 %v3605_v11, %v3170_v0 }
 0xc83   :  { %v2025_v16 = vadd.f32 %v3170_v0, %v2024_v13 }
 0xc84   :  { %v2040_v8 = vadd.f32 %v2030_v14, %v4362_v37 }
 0xc85   :  { %v2039_v17 = vadd.f32 %v2025_v16, %v4360_v36 }
 0xc86   :  { %v2050_v29 = vsel %vm92_vm0, %v2040_v8, 0.0 }
 0xc87   :  { %v2047_v18 = vsel %vm92_vm0, %v2039_v17, 0.0 }
 0xc88   :  { %2048 = vadd.xlane.f32.xlu0 %v2047_v18 }
 0xc8c   :  { %2051 = vadd.xlane.f32.xlu0 %v2050_v29 }
 0xd04   :  { %v2046_v27 = vpop.xlane.xlu1 %2045 }
 0xd05   :  { %v2054_v19 = vmul.f32 0.03125, %v2046_v27  ;;  %v2043_v9 = vpop.xlane.xlu0 %2042 }
 0xd06   :  { %v2053_v20 = vmul.f32 0.03125, %v2043_v9  ;;  %v3196_v9 = vld [vmem:[%s4672_s11 + $0x78] sm:$0xff] }
 0xd07   :  { %v2058_v21 = vsub.f32 %v2038_v7, %v2054_v19  ;;  %v3195_v19 = vld [vmem:[%s4672_s11 + $0x70] sm:$0xff] }
 0xd08   :  { %v2057_v22 = vsub.f32 %v2037_v5, %v2053_v20  ;;  %v3810_v20 = vpack.c.bf16 %v3196_v9, %v3195_v19  ;;  %v2431_v19 = vld [vmem:[%s4676_s15 + $0x50] sm:$0xff]  ;;  %v2432_v9 = vld [vmem:[%s4676_s15 + $0x58] sm:$0xff] }
 0xd09   :  { %v2062_v23 = vmul.f32 %v2058_v21, %v2058_v21 }
 0xd0a   :  { %v2061_v24 = vmul.f32 %v2057_v22, %v2057_v22  ;;  %3811 = vmatprep.subr.bf16.mxu0 %v3810_v20 }
 0xd0b   :  { %v2068_v25 = vsel %vm92_vm0, %v2062_v23, 0.0  ;;  %3813 = vmatpush3.bf16.msra.mxu0 %v3810_v20  ;;  %v3830_v20 = vpack.c.bf16 %v2432_v9, %v2431_v19 }
 0xd0c   :  { %2069 = vadd.xlane.f32.xlu0 %v2068_v25  ;;  %v2065_v36 = vsel %vm92_vm0, %v2061_v24, 0.0 }
 0xd0d   :  { %2066 = vadd.xlane.f32.xlu1 %v2065_v36 }
 0xd15   :  { %v2049_v26 = vpop.xlane.xlu0 %2048 }
 0xd16   :  { %v2055_v37 = vmul.f32 0.03125, %v2049_v26 }
 0xd18   :  { %v4440_v28 = vsub.f32 %v2039_v17, %v2055_v37 }
 0xd19   :  { %v2052_v30 = vpop.xlane.xlu0 %2051 }
 0xd1a   :  { %v2056_v31 = vmul.f32 0.03125, %v2052_v30  ;;  %v2063_v32 = vmul.f32 %v4440_v28, %v4440_v28 }
 0xd1c   :  { %v4444_v33 = vsub.f32 %v2040_v8, %v2056_v31  ;;  %v2071_v45 = vsel %vm92_vm0, %v2063_v32, 0.0 }
 0xd1d   :  { %2072 = vadd.xlane.f32.xlu1 %v2071_v45  ;;  %v3198_v45 = vld [vmem:[%s4673_s12 + $0x1] ss:$0 sm:$0xff] }
 0xd1e   :  { %v2064_v34 = vmul.f32 %v4444_v33, %v4444_v33 }
 0xd20   :  { %v2074_v35 = vsel %vm92_vm0, %v2064_v34, 0.0 }
 0xd21   :  { %2075 = vadd.xlane.f32.xlu0 %v2074_v35 }
 0xd99   :  { %v2070_v52 = vpop.xlane.xlu0 %2069 }
 0xd9a   :  { %v2078_v53 = vmul.f32 0.03125, %v2070_v52  ;;  %v2067_v54 = vpop.xlane.xlu1 %2066 }
 0xd9b   :  { %v2077_v55 = vmul.f32 0.03125, %v2067_v54 }
 0xd9c   :  { %v2082_v56 = vadd.f32 1e-05, %v2078_v53 }
 0xd9d   :  { %v2081_v57 = vadd.f32 1e-05, %v2077_v55 }
 0xd9e   :  { %3952 = vrsqrt.f32 %v2082_v56 }
 0xd9f   :  { %3954 = vrsqrt.f32 %v2081_v57 }
 0xda8   :  { %v3953_v58 = vpop.eup %3952 }
 0xda9   :  { %v3955_v60 = vpop.eup %3954  ;;  %v2090_v61 = vmul.f32 %v3953_v58, %v2058_v21  ;;  %v3184_v21 = vld [vmem:[%s4671_s10 + $0x1] ss:$0 sm:$0xff] }
 0xdaa   :  { %v2073_v62 = vpop.xlane.xlu1 %2072  ;;  %v2089_v63 = vmul.f32 %v3955_v60, %v2057_v22 }
 0xdab   :  { %v2079_v0 = vmul.f32 0.03125, %v2073_v62  ;;  %v2100_v2 = vmul.f32 %v3177_v59, %v2090_v61 }
 0xdac   :  { %v2099_v3 = vmul.f32 %v3177_v59, %v2089_v63 }
 0xdad   :  { %v2083_v4 = vadd.f32 1e-05, %v2079_v0  ;;  %v2110_v10 = vadd.f32 %v3178_v1, %v2100_v2 }
 0xdae   :  { %v2076_v7 = vpop.xlane.xlu0 %2075  ;;  %v2109_v5 = vadd.f32 %v3178_v1, %v2099_v3 }
 0xdaf   :  { %3956 = vrsqrt.f32 %v2083_v4  ;;  %v2080_v6 = vmul.f32 0.03125, %v2076_v7 }
 0xdb0   :  { %3614 = vmatprep.mubr.msk.f32.mxu1 %vm92_vm0, %v2109_v5 }
 0xdb1   :  { %v2084_v11 = vadd.f32 1e-05, %v2080_v6  ;;  %3615 = vmatmul.mubr.msk.f32.vlgmr.msra.gmra.mrb[40].mxu1 %vm92_vm0, %v2110_v10  ;;  %v2425_v6 = vld [vmem:[%s4676_s15 + $0x20] sm:$0xff] }
 0xdb3   :  { %3958 = vrsqrt.f32 %v2084_v11 }
 0xdb9   :  { %v3957_v13 = vpop.eup %3956 }
 0xdba   :  { %v2091_v14 = vmul.f32 %v3957_v13, %v4440_v28  ;;  %v3994_v13 = vmov 0.0|0.0  }
 0xdbb   :  { %3814 = vmatprep.subr.bf16.mxu1 %v3994_v13  ;;  %3826 = vmatprep.subr.bf16.mxu0 %v3994_v13 }
 0xdbc   :  { %v2101_v16 = vmul.f32 %v3177_v59, %v2091_v14  ;;  %v2427_v14 = vld [vmem:[%s4676_s15 + $0x30] sm:$0xff] }
 0xdbd   :  { %v3959_v17 = vpop.eup %3958 }
 0xdbe   :  { %v2111_v18 = vadd.f32 %v3178_v1, %v2101_v16  ;;  %v2092_v8 = vmul.f32 %v3959_v17, %v4444_v33  ;;  %v2428_v16 = vld [vmem:[%s4676_s15 + $0x38] sm:$0xff] }
 0xdbf   :  { %v3818_v17 = vpack.c.bf16 %v2428_v16, %v2427_v14 }
 0xdc0   :  { %3617 = vmatprep.mubr.msk.f32.mxu1 %vm92_vm0, %v2111_v18  ;;  %v2102_v29 = vmul.f32 %v3177_v59, %v2092_v8  ;;  %v2429_v8 = vld [vmem:[%s4676_s15 + $0x40] sm:$0xff] }
 0xdc2   :  { %v2112_v27 = vadd.f32 %v3178_v1, %v2102_v29  ;;  %v2430_v29 = vld [vmem:[%s4676_s15 + $0x48] sm:$0xff] }
 0xdc4   :  { %3618 = vmatmul.mubr.msk.f32.gmra.mrb[42].mxu1 %vm92_vm0, %v2112_v27 }
 0xe84   :  { %v3616_v22 = vpop.f32.mrb[40].mxu1 }
 0xe85   :  { %v2210_v23 = vadd.f32 %v3616_v22, %v3184_v21  ;;  %v2204_v24 = vpop.f32.mrb[41].mxu1 }
 0xe86   :  { %v2205_v25 = vadd.f32 %v3184_v21, %v2204_v24 }
 0xe87   :  { %v2224_v26 = vmax.f32 %v2210_v23, 0.0 }
 0xe88   :  { %v2223_v36 = vmax.f32 %v2205_v25, 0.0 }
 0xe8a   :  { %3636 = vmatprep.mubr.msk.f32.mxu0 %vm1071_vm2, %v2223_v36 }
 0xe8b   :  { %3637 = vmatmul.mubr.msk.f32.vlgmr.msra.gmra.mrb[48].mxu0 %vm1071_vm2, %v2224_v26 }
 0xe97   :  { %v3619_v37 = vpop.f32.mrb[42].mxu1 }
 0xe98   :  { %v2220_v28 = vadd.f32 %v3619_v37, %v3184_v21  ;;  %v2214_v30 = vpop.f32.mrb[43].mxu1  ;;  %v3205_v37 = vld [vmem:[%s4674_s13 + $0x1] ss:$0 sm:$0xff] }
 0xe99   :  { %v2215_v31 = vadd.f32 %v3184_v21, %v2214_v30  ;;  %v2421_v30 = vld [vmem:[%s4676_s15] sm:$0xff] }
 0xe9a   :  { %v2226_v33 = vmax.f32 %v2220_v28, 0.0 }
 0xe9b   :  { %v2225_v32 = vmax.f32 %v2215_v31, 0.0  ;;  %v2422_v31 = vld [vmem:[%s4676_s15 + $0x8] sm:$0xff] }
 0xe9d   :  { %3639 = vmatprep.mubr.msk.f32.mxu0 %vm1071_vm2, %v2225_v32 }
 0xe9e   :  { %3640 = vmatmul.mubr.msk.f32.gmra.mrb[50].mxu0 %vm1071_vm2, %v2226_v33  ;;  %v3206_v33 = vld [vmem:[%s4675_s14 + $0x1] ss:$0 sm:$0xff] }
 0xf5e   :  { %v3638_v34 = vpop.f32.mrb[48].mxu0 }
 0xf5f   :  { %v2328_v35 = vadd.f32 %v3638_v34, %v3198_v45  ;;  %v2322_v12 = vpop.f32.mrb[49].mxu0 }
 0xf60   :  { %v2323_v15 = vadd.f32 %v3198_v45, %v2322_v12 }
 0xf61   :  { %v2346_v38 = vadd.f32 %v2328_v35, %v2110_v10  ;;  %v2426_v10 = vld [vmem:[%s4676_s15 + $0x28] sm:$0xff]  ;;  %v3821_v35 = vpack.c.bf16 %v2422_v31, %v2421_v30 }
 0xf62   :  { %v2345_v39 = vadd.f32 %v2323_v15, %v2109_v5  ;;  %v3815_v11 = vpack.c.bf16 %v2426_v10, %v2425_v6 }
 0xf63   :  { %v2352_v40 = vsel %vm92_vm0, %v2346_v38, 0.0 }
 0xf64   :  { %2353 = vadd.xlane.f32.xlu1 %v2352_v40  ;;  %v2349_v41 = vsel %vm92_vm0, %v2345_v39, 0.0  ;;  %3816 = vmatpush3.bf16.msra.mxu1 %v3815_v11  ;;  %v2423_v40 = vld [vmem:[%s4676_s15 + $0x10] sm:$0xff] }
 0xf65   :  { %2350 = vadd.xlane.f32.xlu0 %v2349_v41  ;;  %3817 = vmatprep.subr.bf16.mxu1 %v3994_v13  ;;  %v2424_v41 = vld [vmem:[%s4676_s15 + $0x18] sm:$0xff] }
 0xf68   :  { %3819 = vmatpush3.bf16.msra.mxu1 %v3818_v17 }
 0xf69   :  { %3820 = vmatprep.subr.bf16.mxu1 %v3994_v13 }
 0xf71   :  { %v3641_v42 = vpop.f32.mrb[50].mxu0 }
 0xf72   :  { %v2338_v43 = vadd.f32 %v3641_v42, %v3198_v45  ;;  %v2332_v44 = vpop.f32.mrb[51].mxu0 }
 0xf73   :  { %v2333_v46 = vadd.f32 %v3198_v45, %v2332_v44 }
 0xf74   :  { %v2348_v47 = vadd.f32 %v2338_v43, %v2112_v27  ;;  %v3827_v27 = vpack.c.bf16 %v2430_v29, %v2429_v8 }
 0xf75   :  { %v2347_v48 = vadd.f32 %v2333_v46, %v2111_v18  ;;  %v3996_v18 = vmov 0.0   ;;  %v3824_v46 = vpack.c.bf16 %v2424_v41, %v2423_v40 }
 0xf76   :  { %v2358_v49 = vsel %vm92_vm0, %v2348_v47, 0.0  ;;  %3650 = vmatprep.mubr.msk.f32.mxu1 %vm3995_vm3, %v3996_v18  ;;  %3672 = vmatprep.mubr.msk.f32.mxu0 %vm3995_vm3, %v3996_v18 }
 0xf77   :  { %2359 = vadd.xlane.f32.xlu0 %v2358_v49  ;;  %v2355_v50 = vsel %vm92_vm0, %v2347_v48, 0.0  ;;  %3828 = vmatpush3.bf16.msra.mxu0 %v3827_v27  ;;  %v2434_v49 = vld [vmem:[%s4676_s15 + $0x68] sm:$0xff]  ;;  %v3211_v27 = vld [vmem:[%s4677_s16] ss:$0 sm:$0xff] }
 0xf78   :  { %2356 = vadd.xlane.f32.xlu1 %v2355_v50  ;;  %3829 = vmatprep.subr.bf16.mxu0 %v3994_v13 }
 0xf7b   :  { %3831 = vmatpush3.bf16.msra.mxu0 %v3830_v20 }
 0xf7c   :  { %3838 = vmatprep.subr.bf16.mxu0 %v3994_v13 }
 0xff1   :  { %v2354_v51 = vpop.xlane.xlu1 %2353 }
 0xff2   :  { %v2362_v52 = vmul.f32 0.03125, %v2354_v51  ;;  %v2351_v53 = vpop.xlane.xlu0 %2350 }
 0xff3   :  { %v2361_v54 = vmul.f32 0.03125, %v2351_v53  ;;  %v2436_v53 = vld [vmem:[%s4676_s15 + $0x78] sm:$0xff] }
 0xff4   :  { %v2366_v55 = vsub.f32 %v2346_v38, %v2362_v52  ;;  %v2435_v52 = vld [vmem:[%s4676_s15 + $0x70] sm:$0xff] }
 0xff5   :  { %v4512_v56 = vsub.f32 %v2345_v39, %v2361_v54  ;;  %v3836_v54 = vpack.c.bf16 %v2436_v53, %v2435_v52 }
 0xff6   :  { %v2370_v57 = vmul.f32 %v2366_v55, %v2366_v55 }
 0xff7   :  { %v2369_v58 = vmul.f32 %v4512_v56, %v4512_v56 }
 0xff8   :  { %v2376_v59 = vsel %vm92_vm0, %v2370_v57, 0.0 }
 0xff9   :  { %2377 = vadd.xlane.f32.xlu1 %v2376_v59  ;;  %v2373_v60 = vsel %vm92_vm0, %v2369_v58, 0.0 }
 0xffa   :  { %2374 = vadd.xlane.f32.xlu0 %v2373_v60 }
0x1004   :  { %v2360_v61 = vpop.xlane.xlu0 %2359 }
0x1005   :  { %v2364_v62 = vmul.f32 0.03125, %v2360_v61  ;;  %v2357_v63 = vpop.xlane.xlu1 %2356 }
0x1006   :  { %v2363_v0 = vmul.f32 0.03125, %v2357_v63  ;;  %v2739_v63 = vld [vmem:[%s4681_s20] sm:$0xff] }
0x1007   :  { %v4518_v1 = vsub.f32 %v2348_v47, %v2364_v62 }
0x1008   :  { %v4520_v2 = vsub.f32 %v2347_v48, %v2363_v0  ;;  %v2433_v48 = vld [vmem:[%s4676_s15 + $0x60] sm:$0xff]  ;;  %v2740_v0 = vld [vmem:[%s4681_s20 + $0x8] sm:$0xff] }
0x1009   :  { %v2372_v3 = vmul.f32 %v4518_v1, %v4518_v1  ;;  %v3833_v50 = vpack.c.bf16 %v2434_v49, %v2433_v48 }
0x100a   :  { %v2371_v4 = vmul.f32 %v4520_v2, %v4520_v2 }
0x100b   :  { %v2382_v7 = vsel %vm92_vm0, %v2372_v3, 0.0  ;;  %v2742_v3 = vld [vmem:[%s4681_s20 + $0x18] sm:$0xff] }
0x100c   :  { %2383 = vadd.xlane.f32.xlu0 %v2382_v7  ;;  %v2379_v5 = vsel %vm92_vm0, %v2371_v4, 0.0  ;;  %v2816_v7 = vld [vmem:[%s4678_s17] sm:$0xf] }
0x100d   :  { %2380 = vadd.xlane.f32.xlu1 %v2379_v5 }
0x1086   :  { %v2378_v21 = vpop.xlane.xlu1 %2377 }
0x1087   :  { %v2386_v22 = vmul.f32 0.03125, %v2378_v21  ;;  %v2375_v23 = vpop.xlane.xlu0 %2374  ;;  %v2891_v21 = vld [vmem:[%s4680_s19] sm:$0xff]  ;;  %s3997_s19 = smov [#allocation2]  }
0x1088   :  { %v2385_v24 = vmul.f32 0.03125, %v2375_v23  ;;  %v2890_v23 = vld [vmem:[%s4679_s18] sm:$0xff]  ;;  %s3059_s1 = sshll.u32 %s3997_s19, 4  ;;  %s3060_s1 = int_to_ptr.vmem [resolvable:$true] %s3059_s1 }
0x1089   :  { %v2390_v25 = vadd.f32 1e-05, %v2386_v22  ;;  %s3968_s18 = scalar_lea.vmem %s3060_s1, 128  ;;  %p3973_p1 = scmp.lt.s32.totalorder %s3060_s1, %s3060_s1 }
0x108a   :  { %v2389_v36 = vadd.f32 1e-05, %v2385_v24  ;;  %p3969_p0 = scmp.ne.s32.totalorder %s3060_s1, %s3968_s18  ;;  %p3974_p2 = scmp.lt.s32.totalorder %s3968_s18, %s3968_s18 }
0x108b   :  { %3960 = vrsqrt.f32 %v2390_v25 }
0x108c   :  { %3962 = vrsqrt.f32 %v2389_v36  ;;  %p3975_p3 = por %p3974_p2, %p3973_p1 }
0x108e   :  { %p3976_p4 = pnand %p3975_p3, %p3969_p0 }
0x1095   :  { %v3961_v26 = vpop.eup %3960 }
0x1096   :  { %v2398_v28 = vmul.f32 %v3961_v26, %v2366_v55  ;;  %v3963_v32 = vpop.eup %3962 }
0x1097   :  { %v2397_v15 = vmul.f32 %v3963_v32, %v4512_v56 }
0x1098   :  { %v2408_v45 = vmul.f32 %v3205_v37, %v2398_v28 }
0x1099   :  { %v2384_v34 = vpop.xlane.xlu0 %2383  ;;  %v2407_v47 = vmul.f32 %v3205_v37, %v2397_v15 }
0x109a   :  { %v2418_v12 = vadd.f32 %v3206_v33, %v2408_v45  ;;  %v2388_v38 = vmul.f32 0.03125, %v2384_v34  ;;  %v2381_v39 = vpop.xlane.xlu1 %2380 }
0x109b   :  { %v2387_v42 = vmul.f32 0.03125, %v2381_v39  ;;  %v2417_v51 = vadd.f32 %v3206_v33, %v2407_v47 }
0x109c   :  { %v2392_v43 = vadd.f32 1e-05, %v2388_v38  ;;  %3651 = vmatmul.mubr.msk.f32.vlgmr.msra.gmra.mrb[44].mxu1 %vm92_vm0, %v2418_v12 }
0x109d   :  { %v2391_v44 = vadd.f32 1e-05, %v2387_v42  ;;  %3822 = vmatpush3.bf16.msra.mxu1 %v3821_v35  ;;  %3661 = vmatprep.mubr.msk.f32.mxu1 %vm3995_vm3, %v3996_v18 }
0x109e   :  { %3964 = vrsqrt.f32 %v2392_v43  ;;  %3823 = vmatprep.subr.bf16.mxu1 %v3994_v13 }
0x109f   :  { %3966 = vrsqrt.f32 %v2391_v44 }
0x10a1   :  { %3825 = vmatpush3.bf16.msra.mxu1 %v3824_v46 }
0x10a2   :  { %3832 = vmatprep.subr.bf16.mxu1 %v3994_v13 }
0x10a4   :  { %3662 = vmatmul.mubr.msk.f32.vlgmr.msra.gmra.mrb[46].mxu1 %vm92_vm0, %v2417_v51 }
0x10a5   :  { %3834 = vmatpush3.bf16.msra.mxu1 %v3833_v50  ;;  %3683 = vmatprep.mubr.msk.f32.mxu1 %vm3995_vm3, %v3996_v18 }
0x10a6   :  { %3835 = vmatprep.subr.bf16.mxu1 %v3994_v13 }
0x10a8   :  { %v3965_v55 = vpop.eup %3964 }
0x10a9   :  { %v3967_v56 = vpop.eup %3966  ;;  %v2400_v57 = vmul.f32 %v3965_v55, %v4518_v1  ;;  %3837 = vmatpush3.bf16.msra.mxu1 %v3836_v54  ;;  %v3839_v1 = vpack.c.bf16 %v2740_v0, %v2739_v63 }
0x10aa   :  { %v2399_v58 = vmul.f32 %v3967_v56, %v4520_v2  ;;  %3844 = vmatprep.subr.bf16.mxu1 %v3994_v13  ;;  %v2741_v2 = vld [vmem:[%s4681_s20 + $0x10] sm:$0xff] }
0x10ab   :  { %v2410_v59 = vmul.f32 %v3205_v37, %v2400_v57  ;;  %v3842_v4 = vpack.c.bf16 %v2742_v3, %v2741_v2 }
0x10ac   :  { %v2409_v60 = vmul.f32 %v3205_v37, %v2399_v58  ;;  %v3217_v37 = vld [vmem:[%s4682_s21] ss:$0 sm:$0xff] }
0x10ad   :  { %v2420_v61 = vadd.f32 %v3206_v33, %v2410_v59 }
0x10ae   :  { %v2419_v62 = vadd.f32 %v3206_v33, %v2409_v60 }
0x10af   :  { %3684 = vmatmul.mubr.msk.f32.vlgmr.msra.gmra.mrb[48].mxu1 %vm92_vm0, %v2420_v61 }
0x10b0   :  { %3673 = vmatmul.mubr.msk.f32.vlgmr.msra.gmra.mrb[52].mxu0 %vm92_vm0, %v2419_v62  ;;  %3705 = vmatprep.mubr.msk.f32.mxu1 %vm3995_vm3, %v3996_v18 }
0x10b1   :  { %3694 = vmatprep.mubr.msk.f32.mxu0 %vm3995_vm3, %v3996_v18  ;;  %3846 = vmatpush3.bf16.msra.mxu1 %v3839_v1 }
0x10b2   :  { %3840 = vmatpush3.bf16.msra.mxu0 %v3839_v1  ;;  %3847 = vmatprep.subr.bf16.mxu1 %v3994_v13 }
0x10b3   :  { %3841 = vmatprep.subr.bf16.mxu0 %v3994_v13 }
0x10b5   :  { %3849 = vmatpush3.bf16.msra.mxu1 %v3842_v4 }
0x10b6   :  { %3843 = vmatpush3.bf16.msra.mxu0 %v3842_v4  ;;  %3713 = vmatprep.subr.mxu1 %v3996_v18 }
0x10b7   :  { %3708 = vmatprep.subr.mxu0 %v3996_v18 }
0x10b8   :  { %3706 = vmatmul.mubr.msk.f32.vlgmr.msra.gmra.mrb[50].mxu1 %vm92_vm0, %v2816_v7 }
0x10b9   :  { %3715 = vmatprep.mubr.msk.f32.mxu1 %vm3995_vm3, %v3996_v18 }
0x116f   :  { %v2506_v5 = vpop.f32.mrb[44].mxu1 }
0x1170   :  { %v3652_v6 = vpop.f32.mrb[45].mxu1 }
0x1177   :  { %v2579_v10 = vpop.f32.mrb[46].mxu1 }
0x1178   :  { %v2580_v11 = vadd.f32 %v2579_v10, %v2506_v5  ;;  %v3663_v13 = vpop.f32.mrb[47].mxu1 }
0x1182   :  { %v2726_v14 = vpop.f32.mrb[48].mxu1 }
0x1183   :  { %v2652_v16 = vpop.f32.mrb[52].mxu0  ;;  %v3685_v17 = vpop.f32.mrb[49].mxu1 }
0x1184   :  { %v2656_v8 = vadd.f32 %v2652_v16, %v2580_v11  ;;  %v3674_v29 = vpop.f32.mrb[53].mxu0 }
0x1186   :  { %v2730_v19 = vadd.f32 %v2726_v14, %v2656_v8 }
0x1188   :  { %v2738_v9 = vadd.f32 %v3211_v27, %v2730_v19 }
0x118a   :  { %3695 = vmatmul.mubr.msk.f32.vlgmr.msra.gmra.mrb[54].mxu0 %vm92_vm0, %v2738_v9 }
0x118b   :  { %3710 = vmatprep.mubr.msk.f32.mxu0 %vm3995_vm3, %v3996_v18  ;;  %v2886_v20 = vpop.f32.mrb[50].mxu1 }
0x118c   :  { %v3707_v22 = vpop.f32.mrb[51].mxu1  ;;  %3709 = vmatpush3.msk.msra.mxu0 %vm2896_vm4, %v2886_v20 }
0x118e   :  { %3711 = vmatmul.mubr.msk.f32.vlgmr.msra.gmra.mrb[56].mxu0 %vm2892_vm5, %v2891_v21 }
0x125d   :  { %v2812_v24 = vpop.f32.mrb[54].mxu0 }
0x125e   :  { %v3696_v25 = vpop.f32.mrb[55].mxu0  ;;  %3714 = vmatpush3.msra.mxu1 %v2812_v24 }
0x125f   :  { %3716 = vmatmul.mubr.msk.f32.vlgmr.msra.gmra.mrb[52].mxu1 %vm523_vm1, %v2890_v23 }
0x1261   :  { %v2966_v18 = vpop.f32.mrb[56].mxu0 }
0x1262   :  { %v3712_v36 = vpop.f32.mrb[57].mxu0 }
0x1332   :  { %v3039_v26 = vpop.f32.mrb[52].mxu1 }
0x1333   :  { %v3040_v28 = vadd.f32 %v3039_v26, %v2966_v18  ;;  %v3717_v30 = vpop.f32.mrb[53].mxu1 }
0x1335   :  { %v3050_v31 = vadd.f32 %v3217_v37, %v3040_v28 }
0x1337   :  { %3052 = vst.msk [vmem:[#allocation2] sm:$0xff] %vm3051_vm6, %v3050_v31 }
0x1338   :  { %3979 = shalt.err (!%p3976_p4)
}
0x1339   :  { %s3980_s26 = scalar_lea.hbm %s4683_s22, 128 }
0x133a   :  { %p3981_p5 = scmp.ne.s32.totalorder %s4683_s22, %s3980_s26  ;;  %p3984_p6 = scmp.lt.u32.totalorder %s3980_s26, %s4683_s22 }
0x133c   :  { %p3986_p7 = pnand %p3984_p6, %p3981_p5 }
0x133e   :  { %3989 = shalt.err (!%p3986_p7)
}
0x133f   :  { %3062 = dma.vmem_to_hbm [thread:$0]  %s3060_s1, 128, %s4683_s22, [#allocation3]  }
0x1340   :  { %3990 = dma.done.wait [#allocation3], 128  }
0x1341   :  { %3991 = vsyncadd [#allocation3], 4294967168 }
0x1342   :  { %3066 = vsyncpa [#allocation3], 1 }

</bundles_post_ra>
